<compile_context>
chip_gen: v7x
topology: tpu7x:2x2x1
jax: 0.10.0
libtpu: 0.0.40
codegen_flags: <defaults>
</compile_context>

<pallas_src>
import math

import jax
import jax.numpy as jnp
from jax.experimental import pallas as pl
from jax.experimental.pallas import tpu as pltpu

# ---------------- synthetic model config (small, consistent with the module) ----------------
PATCH = 14            # DINOv2 patch size
IMG = 28              # 28x28 image -> 2x2 = 4 patches
CIN = 3               # RGB
D = 32                # hidden dim
NHEADS = 2
HEAD_DIM = D // NHEADS
MLP_HIDDEN = 4 * D
DEPTH = 2             # number of transformer blocks
N_RTOKENS = 10        # robust tokens (n_rtokens in the module)
EPS = 1e-6            # DINOv2 LayerNorm eps
B = 2
NPATCH = (IMG // PATCH) ** 2          # 4
KIN = CIN * PATCH * PATCH             # 588
KPAD = ((KIN + 127) // 128) * 128     # 640 (lane-aligned K for the patch-embed matmul)

# packed per-block parameter layout: rows 0..D-1 = weights, row D = biases; 4 lane segments
SEG = 128
BLK_ROWS = 40                          # D weight rows + 1 bias row, padded to sublane multiple
BLK_LANES = 4 * SEG                    # [wqkv | wproj | w1 | w2^T], each padded to 128 lanes


# ---------------------------------- in-kernel helpers ----------------------------------
def _ln_core(h):
    # LayerNorm without affine (gamma/beta are folded into the following matmul).
    mu = jnp.mean(h, axis=-1, keepdims=True)
    var = jnp.mean(jnp.square(h - mu), axis=-1, keepdims=True)
    return (h - mu) * jax.lax.rsqrt(var + EPS)


def _erf(x):
    # Abramowitz & Stegun 7.1.26 polynomial erf (|err| < 1.5e-7): erf-GELU to f32 noise level.
    ax = jnp.abs(x)
    t = 1.0 / (1.0 + 0.3275911 * ax)
    poly = t * (0.254829592 + t * (-0.284496736 + t * (1.421413741
                + t * (-1.453152027 + t * 1.061405429))))
    y = 1.0 - poly * jnp.exp(-ax * ax)
    return jnp.where(x < 0, -y, y)


def _gelu_erf(x):
    # PyTorch nn.GELU default (erf-based), not the tanh approximation.
    return 0.5 * x * (1.0 + _erf(x * 0.7071067811865476))


# ---------------------------------- fused Pallas kernel ----------------------------------
def _make_kernel(ntok_pad):
    def kernel(patches_ref, pw_ref, blk_ref, const_ref, o_ref):
        cst = const_ref[...]                                   # (ntok_pad + 3, D)
        tok_base = cst[0:ntok_pad, :]                          # cls+pos0 | pos+patch_b | rtokens | 0-pad
        norm_w = cst[ntok_pad:ntok_pad + 1, :]
        norm_b = cst[ntok_pad + 1:ntok_pad + 2, :]
        key_bias = cst[ntok_pad + 2:ntok_pad + 3, 0:ntok_pad]  # (1, ntok_pad): 0 valid / -1e30 pad

        # patch embed (rows 1..NPATCH of the slab; zero rows contribute nothing) + token assembly
        x = tok_base + jnp.dot(patches_ref[...], pw_ref[...],
                               preferred_element_type=jnp.float32)   # (ntok_pad, D)

        for d in range(DEPTH):                                 # static depth, weights VMEM-resident
            Wd = blk_ref[d]                                    # (BLK_ROWS, BLK_LANES)
            wqkv = Wd[0:D, 0:3 * D]                            # LN1 gamma + 1/sqrt(hd) folded in
            bqkv = Wd[D:D + 1, 0:3 * D]
            wproj = Wd[0:D, SEG:SEG + D]                       # LayerScale ls1 folded in
            bproj = Wd[D:D + 1, SEG:SEG + D]
            w1 = Wd[0:D, 2 * SEG:2 * SEG + MLP_HIDDEN]         # LN2 gamma folded in
            b1 = Wd[D:D + 1, 2 * SEG:2 * SEG + MLP_HIDDEN]
            w2t = Wd[0:D, 3 * SEG:3 * SEG + MLP_HIDDEN]        # w2^T, LayerScale ls2 folded in
            b2 = Wd[D:D + 1, 3 * SEG:3 * SEG + D]

            # --- attention ---
            h = _ln_core(x)
            qkv = jnp.dot(h, wqkv, preferred_element_type=jnp.float32) + bqkv   # (ntok_pad, 3D)
            heads = []
            for hh in range(NHEADS):
                lo = hh * HEAD_DIM
                q = qkv[:, lo:lo + HEAD_DIM]
                k = qkv[:, D + lo:D + lo + HEAD_DIM]
                v = qkv[:, 2 * D + lo:2 * D + lo + HEAD_DIM]
                s = jax.lax.dot_general(q, k, (((1,), (1,)), ((), ())),
                                        preferred_element_type=jnp.float32)     # (ntok_pad, ntok_pad)
                s = s + key_bias                              # mask padded key columns
                s = s - jnp.max(s, axis=-1, keepdims=True)
                p = jnp.exp(s)
                p = p / jnp.sum(p, axis=-1, keepdims=True)    # exact divide (parity-safe)
                heads.append(jnp.dot(p, v, preferred_element_type=jnp.float32))
            attn = jnp.concatenate(heads, axis=-1)            # in-register, no scratch stores
            x = x + jnp.dot(attn, wproj, preferred_element_type=jnp.float32) + bproj

            # --- MLP ---
            h2 = _ln_core(x)
            m = jnp.dot(h2, w1, preferred_element_type=jnp.float32) + b1
            m = _gelu_erf(m)
            x = x + jax.lax.dot_general(m, w2t, (((1,), (1,)), ((), ())),
                                        preferred_element_type=jnp.float32) + b2

        # final LayerNorm; full padded slab written out, token selection done in the wrapper
        o_ref[...] = _ln_core(x) * norm_w + norm_b

    return kernel


# ---------------------------------- glue (plain JAX) ----------------------------------
def patchify_slab(x, ntok_pad):
    # x: (B, C, H, W) NCHW -> (B*ntok_pad, KPAD); patch vectors placed at token rows 1..NPATCH,
    # K zero-padded 588 -> 640; all other rows zero so the patch-embed matmul is a single
    # aligned full-width push per batch.
    b, c, h, w = x.shape
    gh, gw = h // PATCH, w // PATCH
    p = x.reshape(b, c, gh, PATCH, gw, PATCH)
    p = p.transpose(0, 2, 4, 1, 3, 5).reshape(b, gh * gw, c * PATCH * PATCH)   # matches Conv2d flatten
    slab = jnp.zeros((b, ntok_pad, KPAD), jnp.float32)
    slab = slab.at[:, 1:1 + gh * gw, :KIN].set(p)
    return slab.reshape(b * ntok_pad, KPAD)


def init_params(key):
    """Raw parameters mirroring the module (patch embed, cls/pos, rtokens, DEPTH blocks, norm)."""
    keys = jax.random.split(key, 4 + DEPTH)
    p = {
        "patch_w": 0.02 * jax.random.normal(keys[0], (KIN, D), jnp.float32),
        "patch_b": jnp.zeros((D,), jnp.float32),
        "cls_token": 0.02 * jax.random.normal(keys[1], (D,), jnp.float32),
        "pos_embed": 0.02 * jax.random.normal(keys[2], (1 + NPATCH, D), jnp.float32),
        # rtokens: 0.01 * randn(1, n_rtokens, hidden_dim), as in the module __init__
        "rtokens": 0.01 * jax.random.normal(keys[3], (N_RTOKENS, D), jnp.float32),
        "norm_w": jnp.ones((D,), jnp.float32),
        "norm_b": jnp.zeros((D,), jnp.float32),
        "blocks": [],
    }
    for i in range(DEPTH):
        bk = jax.random.split(keys[4 + i], 5)
        p["blocks"].append({
            "n1w": jnp.ones((D,), jnp.float32), "n1b": jnp.zeros((D,), jnp.float32),
            "wqkv": 0.02 * jax.random.normal(bk[0], (D, 3 * D), jnp.float32),
            "bqkv": 0.02 * jax.random.normal(bk[1], (3 * D,), jnp.float32),
            "wproj": 0.02 * jax.random.normal(bk[2], (D, D), jnp.float32),
            "bproj": jnp.zeros((D,), jnp.float32),
            "g1": 1e-5 * jnp.ones((D,), jnp.float32),
            "n2w": jnp.ones((D,), jnp.float32), "n2b": jnp.zeros((D,), jnp.float32),
            "w1": 0.02 * jax.random.normal(bk[3], (D, MLP_HIDDEN), jnp.float32),
            "b1": jnp.zeros((MLP_HIDDEN,), jnp.float32),
            "w2": 0.02 * jax.random.normal(bk[4], (MLP_HIDDEN, D), jnp.float32),
            "b2": jnp.zeros((D,), jnp.float32),
            "g2": 1e-5 * jnp.ones((D,), jnp.float32),
        })
    return p


def pack_params(p, enable_robust=True):
    """Inference-exact folds + packing into 3 lane-aligned arrays (fewer, bigger DMAs)."""
    use_rt = enable_robust and N_RTOKENS > 0
    ntok = 1 + NPATCH + (N_RTOKENS if use_rt else 0)
    ntok_pad = ((ntok + 7) // 8) * 8
    qscale = 1.0 / math.sqrt(HEAD_DIM)

    # patch-embed weight: K rows zero-padded to KPAD (matches zero-padded patch vectors)
    patch_w = jnp.zeros((KPAD, D), jnp.float32).at[:KIN, :].set(p["patch_w"])

    # const slab: token base rows | final norm w,b | additive softmax key mask
    const = jnp.zeros((ntok_pad + 3, D), jnp.float32)
    const = const.at[0, :].set(p["cls_token"] + p["pos_embed"][0])
    const = const.at[1:1 + NPATCH, :].set(p["pos_embed"][1:] + p["patch_b"][None, :])
    if use_rt:
        const = const.at[1 + NPATCH:1 + NPATCH + N_RTOKENS, :].set(p["rtokens"])
    const = const.at[ntok_pad, :].set(p["norm_w"])
    const = const.at[ntok_pad + 1, :].set(p["norm_b"])
    key_bias = jnp.where(jnp.arange(ntok_pad) < ntok, 0.0, -1e30).astype(jnp.float32)
    const = const.at[ntok_pad + 2, :ntok_pad].set(key_bias)

    blk = jnp.zeros((DEPTH, BLK_ROWS, BLK_LANES), jnp.float32)
    for d, bp in enumerate(p["blocks"]):
        # fold 1/sqrt(HEAD_DIM) into the Q columns, then LN1 gamma/beta into wqkv/bqkv
        wqkv = bp["wqkv"].at[:, :D].multiply(qscale)
        bqkv = bp["bqkv"].at[:D].multiply(qscale)
        wqkv_f = bp["n1w"][:, None] * wqkv
        bqkv_f = bp["n1b"] @ wqkv + bqkv
        # fold LayerScale ls1 into the attention projection
        wproj_f = bp["wproj"] * bp["g1"][None, :]
        bproj_f = bp["bproj"] * bp["g1"]
        # fold LN2 gamma/beta into the MLP up-projection
        w1_f = bp["n2w"][:, None] * bp["w1"]
        b1_f = bp["n2b"] @ bp["w1"] + bp["b1"]
        # fold LayerScale ls2 into the MLP down-projection; store transposed (32 rows)
        w2_f = bp["w2"] * bp["g2"][None, :]
        b2_f = bp["b2"] * bp["g2"]
        w2t = w2_f.T

        blk = blk.at[d, 0:D, 0:3 * D].set(wqkv_f)
        blk = blk.at[d, D, 0:3 * D].set(bqkv_f)
        blk = blk.at[d, 0:D, SEG:SEG + D].set(wproj_f)
        blk = blk.at[d, D, SEG:SEG + D].set(bproj_f)
        blk = blk.at[d, 0:D, 2 * SEG:2 * SEG + MLP_HIDDEN].set(w1_f)
        blk = blk.at[d, D, 2 * SEG:2 * SEG + MLP_HIDDEN].set(b1_f)
        blk = blk.at[d, 0:D, 3 * SEG:3 * SEG + MLP_HIDDEN].set(w2t)
        blk = blk.at[d, D, 3 * SEG:3 * SEG + D].set(b2_f)

    return {"patch_w": patch_w, "blk": blk, "const": const}


def dinov2_robustifier_forward(packed, x):
    """Mirrors DinoV2Robustifier.dino_forward (no register tokens, return_all=False) as one
    fused Pallas kernel; batch is a 'parallel' grid axis (both TensorCores on v7x)."""
    b = x.shape[0]
    ntok_pad = packed["const"].shape[0] - 3        # static (derived from array shape)
    patches = patchify_slab(x, ntok_pad)           # (B*ntok_pad, KPAD)
    kernel = _make_kernel(ntok_pad)
    out = pl.pallas_call(
        kernel,
        out_shape=jax.ShapeDtypeStruct((b * ntok_pad, D), jnp.float32),
        grid=(b,),
        in_specs=[
            pl.BlockSpec((ntok_pad, KPAD), lambda i: (i, 0)),                 # per-batch patches
            pl.BlockSpec((KPAD, D), lambda i: (0, 0)),                        # patch-embed weight
            pl.BlockSpec((DEPTH, BLK_ROWS, BLK_LANES), lambda i: (0, 0, 0)),  # packed block params
            pl.BlockSpec((ntok_pad + 3, D), lambda i: (0, 0)),                # packed constants
        ],
        out_specs=pl.BlockSpec((ntok_pad, D), lambda i: (i, 0)),
        compiler_params=pltpu.CompilerParams(dimension_semantics=("parallel",)),
    )(patches, packed["patch_w"], packed["blk"], packed["const"])
    out = out.reshape(b, ntok_pad, D)
    return out[:, :1 + NPATCH, :]                  # cat(cls, patch_tokens), as the module returns


if __name__ == "__main__":
    key = jax.random.PRNGKey(0)
    pkey, xkey = jax.random.split(key)
    raw = init_params(pkey)
    packed = pack_params(raw, enable_robust=True)
    x = jax.random.normal(xkey, (B, CIN, IMG, IMG), jnp.float32)   # NCHW, like PyTorch
    fwd = jax.jit(dinov2_robustifier_forward)
    out = fwd(packed, x)
    jax.block_until_ready(out)
    assert out.shape == (B, 1 + NPATCH, D), out.shape
    assert bool(jnp.all(jnp.isfinite(out)))
    print("KERNEL_OK")
</pallas_src>

<mosaic_0001>
module attributes {stable_mosaic.version = 11 : i64} {
  func.func @kernel(%arg0: i32, %arg1: memref<16x640xf32, #tpu.memory_space<vmem>>, %arg2: memref<640x32xf32, #tpu.memory_space<vmem>>, %arg3: memref<2x40x512xf32, #tpu.memory_space<vmem>>, %arg4: memref<19x32xf32, #tpu.memory_space<vmem>>, %arg5: memref<16x32xf32, #tpu.memory_space<vmem>>) attributes {dimension_semantics = [#tpu.dimension_semantics<parallel>], iteration_bounds = array<i64: 2>, scalar_prefetch = 0 : i64, scratch_operands = 0 : i64, tpu.core_type = #tpu.core_type<tc>, window_params = [{transform_indices = @transform_0, window_bounds = array<i64: 16, 640>}, {pipeline_mode = #tpu.pipeline_mode<synchronous>, transform_indices = @transform_1, window_bounds = array<i64: 640, 32>}, {pipeline_mode = #tpu.pipeline_mode<synchronous>, transform_indices = @transform_2, window_bounds = array<i64: 2, 40, 512>}, {pipeline_mode = #tpu.pipeline_mode<synchronous>, transform_indices = @transform_3, window_bounds = array<i64: 19, 32>}, {transform_indices = @transform_4, window_bounds = array<i64: 16, 32>}]} {
    %c0 = arith.constant 0 : index
    %c0_0 = arith.constant 0 : index
    %0 = vector.load %arg4[%c0, %c0_0] : memref<19x32xf32, #tpu.memory_space<vmem>>, vector<19x32xf32>
    %1 = vector.extract_strided_slice %0 {offsets = [0, 0], sizes = [16, 32], strides = [1, 1]} : vector<19x32xf32> to vector<16x32xf32>
    %2 = vector.extract_strided_slice %0 {offsets = [16, 0], sizes = [1, 32], strides = [1, 1]} : vector<19x32xf32> to vector<1x32xf32>
    %3 = vector.extract_strided_slice %0 {offsets = [17, 0], sizes = [1, 32], strides = [1, 1]} : vector<19x32xf32> to vector<1x32xf32>
    %4 = vector.extract_strided_slice %0 {offsets = [18, 0], sizes = [1, 16], strides = [1, 1]} : vector<19x32xf32> to vector<1x16xf32>
    %c0_1 = arith.constant 0 : index
    %c0_2 = arith.constant 0 : index
    %5 = vector.load %arg1[%c0_1, %c0_2] : memref<16x640xf32, #tpu.memory_space<vmem>>, vector<16x640xf32>
    %c0_3 = arith.constant 0 : index
    %c0_4 = arith.constant 0 : index
    %6 = vector.load %arg2[%c0_3, %c0_4] : memref<640x32xf32, #tpu.memory_space<vmem>>, vector<640x32xf32>
    %cst = arith.constant dense<0.000000e+00> : vector<16x32xf32>
    %7 = tpu.matmul %5, %6, %cst {dimension_numbers = #tpu.dot_dimension_numbers<[1], [0], [0], [1], [0, 0, 1, 1], [], []>} : vector<16x640xf32>, vector<640x32xf32>, vector<16x32xf32> -> vector<16x32xf32>
    %8 = arith.addf %1, %7 : vector<16x32xf32>
    %c0_5 = arith.constant 0 : index
    %c0_6 = arith.constant 0 : index
    %c0_7 = arith.constant 0 : index
    %9 = vector.load %arg3[%c0_5, %c0_6, %c0_7] : memref<2x40x512xf32, #tpu.memory_space<vmem>>, vector<1x40x512xf32>
    %10 = vector.shape_cast %9 : vector<1x40x512xf32> to vector<40x512xf32>
    %11 = vector.extract_strided_slice %10 {offsets = [0, 0], sizes = [32, 96], strides = [1, 1]} : vector<40x512xf32> to vector<32x96xf32>
    %12 = vector.extract_strided_slice %10 {offsets = [32, 0], sizes = [1, 96], strides = [1, 1]} : vector<40x512xf32> to vector<1x96xf32>
    %13 = vector.extract_strided_slice %10 {offsets = [0, 128], sizes = [32, 32], strides = [1, 1]} : vector<40x512xf32> to vector<32x32xf32>
    %14 = vector.extract_strided_slice %10 {offsets = [32, 128], sizes = [1, 32], strides = [1, 1]} : vector<40x512xf32> to vector<1x32xf32>
    %15 = vector.extract_strided_slice %10 {offsets = [0, 256], sizes = [32, 128], strides = [1, 1]} : vector<40x512xf32> to vector<32x128xf32>
    %16 = vector.extract_strided_slice %10 {offsets = [32, 256], sizes = [1, 128], strides = [1, 1]} : vector<40x512xf32> to vector<1x128xf32>
    %17 = vector.extract_strided_slice %10 {offsets = [0, 384], sizes = [32, 128], strides = [1, 1]} : vector<40x512xf32> to vector<32x128xf32>
    %18 = vector.extract_strided_slice %10 {offsets = [32, 384], sizes = [1, 32], strides = [1, 1]} : vector<40x512xf32> to vector<1x32xf32>
    %cst_8 = arith.constant dense<0.000000e+00> : vector<16xf32>
    %19 = vector.multi_reduction <add>, %8, %cst_8 [1] : vector<16x32xf32> to vector<16xf32>
    %20 = vector.shape_cast %19 : vector<16xf32> to vector<16x1xf32>
    %cst_9 = arith.constant 3.200000e+01 : f32
    %21 = vector.broadcast %cst_9 : f32 to vector<16x1xf32>
    %22 = arith.divf %20, %21 : vector<16x1xf32>
    %23 = vector.broadcast %22 : vector<16x1xf32> to vector<16x32xf32>
    %24 = arith.subf %8, %23 : vector<16x32xf32>
    %25 = arith.mulf %24, %24 : vector<16x32xf32>
    %cst_10 = arith.constant dense<0.000000e+00> : vector<16xf32>
    %26 = vector.multi_reduction <add>, %25, %cst_10 [1] : vector<16x32xf32> to vector<16xf32>
    %27 = vector.shape_cast %26 : vector<16xf32> to vector<16x1xf32>
    %cst_11 = arith.constant 3.200000e+01 : f32
    %28 = vector.broadcast %cst_11 : f32 to vector<16x1xf32>
    %29 = arith.divf %27, %28 : vector<16x1xf32>
    %30 = vector.broadcast %22 : vector<16x1xf32> to vector<16x32xf32>
    %31 = arith.subf %8, %30 : vector<16x32xf32>
    %cst_12 = arith.constant 9.99999997E-7 : f32
    %32 = vector.broadcast %cst_12 : f32 to vector<16x1xf32>
    %33 = arith.addf %29, %32 : vector<16x1xf32>
    %34 = math.rsqrt %33 : vector<16x1xf32>
    %35 = vector.broadcast %34 : vector<16x1xf32> to vector<16x32xf32>
    %36 = arith.mulf %31, %35 : vector<16x32xf32>
    %cst_13 = arith.constant dense<0.000000e+00> : vector<16x96xf32>
    %37 = tpu.matmul %36, %11, %cst_13 {dimension_numbers = #tpu.dot_dimension_numbers<[1], [0], [0], [1], [0, 0, 1, 1], [], []>} : vector<16x32xf32>, vector<32x96xf32>, vector<16x96xf32> -> vector<16x96xf32>
    %38 = vector.broadcast %12 : vector<1x96xf32> to vector<16x96xf32>
    %39 = arith.addf %37, %38 : vector<16x96xf32>
    %40 = vector.extract_strided_slice %39 {offsets = [0, 0], sizes = [16, 16], strides = [1, 1]} : vector<16x96xf32> to vector<16x16xf32>
    %41 = vector.extract_strided_slice %39 {offsets = [0, 32], sizes = [16, 16], strides = [1, 1]} : vector<16x96xf32> to vector<16x16xf32>
    %42 = vector.extract_strided_slice %39 {offsets = [0, 64], sizes = [16, 16], strides = [1, 1]} : vector<16x96xf32> to vector<16x16xf32>
    %cst_14 = arith.constant dense<0.000000e+00> : vector<16x16xf32>
    %43 = tpu.matmul %40, %41, %cst_14 {dimension_numbers = #tpu.dot_dimension_numbers<[1], [1], [0], [0], [0, 0, 1, 0], [], []>} : vector<16x16xf32>, vector<16x16xf32>, vector<16x16xf32> -> vector<16x16xf32>
    %44 = vector.broadcast %4 : vector<1x16xf32> to vector<16x16xf32>
    %45 = arith.addf %43, %44 : vector<16x16xf32>
    %cst_15 = arith.constant dense<0xFF800000> : vector<16xf32>
    %46 = vector.multi_reduction <maximumf>, %45, %cst_15 [1] : vector<16x16xf32> to vector<16xf32>
    %47 = vector.shape_cast %46 : vector<16xf32> to vector<16x1xf32>
    %48 = vector.broadcast %47 : vector<16x1xf32> to vector<16x16xf32>
    %49 = arith.subf %45, %48 : vector<16x16xf32>
    %50 = math.exp %49 : vector<16x16xf32>
    %cst_16 = arith.constant dense<0.000000e+00> : vector<16xf32>
    %51 = vector.multi_reduction <add>, %50, %cst_16 [1] : vector<16x16xf32> to vector<16xf32>
    %52 = vector.shape_cast %51 : vector<16xf32> to vector<16x1xf32>
    %53 = vector.broadcast %52 : vector<16x1xf32> to vector<16x16xf32>
    %54 = arith.divf %50, %53 : vector<16x16xf32>
    %cst_17 = arith.constant dense<0.000000e+00> : vector<16x16xf32>
    %55 = tpu.matmul %54, %42, %cst_17 {dimension_numbers = #tpu.dot_dimension_numbers<[1], [0], [0], [1], [0, 0, 1, 1], [], []>} : vector<16x16xf32>, vector<16x16xf32>, vector<16x16xf32> -> vector<16x16xf32>
    %56 = vector.extract_strided_slice %39 {offsets = [0, 16], sizes = [16, 16], strides = [1, 1]} : vector<16x96xf32> to vector<16x16xf32>
    %57 = vector.extract_strided_slice %39 {offsets = [0, 48], sizes = [16, 16], strides = [1, 1]} : vector<16x96xf32> to vector<16x16xf32>
    %58 = vector.extract_strided_slice %39 {offsets = [0, 80], sizes = [16, 16], strides = [1, 1]} : vector<16x96xf32> to vector<16x16xf32>
    %cst_18 = arith.constant dense<0.000000e+00> : vector<16x16xf32>
    %59 = tpu.matmul %56, %57, %cst_18 {dimension_numbers = #tpu.dot_dimension_numbers<[1], [1], [0], [0], [0, 0, 1, 0], [], []>} : vector<16x16xf32>, vector<16x16xf32>, vector<16x16xf32> -> vector<16x16xf32>
    %60 = vector.broadcast %4 : vector<1x16xf32> to vector<16x16xf32>
    %61 = arith.addf %59, %60 : vector<16x16xf32>
    %cst_19 = arith.constant dense<0xFF800000> : vector<16xf32>
    %62 = vector.multi_reduction <maximumf>, %61, %cst_19 [1] : vector<16x16xf32> to vector<16xf32>
    %63 = vector.shape_cast %62 : vector<16xf32> to vector<16x1xf32>
    %64 = vector.broadcast %63 : vector<16x1xf32> to vector<16x16xf32>
    %65 = arith.subf %61, %64 : vector<16x16xf32>
    %66 = math.exp %65 : vector<16x16xf32>
    %cst_20 = arith.constant dense<0.000000e+00> : vector<16xf32>
    %67 = vector.multi_reduction <add>, %66, %cst_20 [1] : vector<16x16xf32> to vector<16xf32>
    %68 = vector.shape_cast %67 : vector<16xf32> to vector<16x1xf32>
    %69 = vector.broadcast %68 : vector<16x1xf32> to vector<16x16xf32>
    %70 = arith.divf %66, %69 : vector<16x16xf32>
    %cst_21 = arith.constant dense<0.000000e+00> : vector<16x16xf32>
    %71 = tpu.matmul %70, %58, %cst_21 {dimension_numbers = #tpu.dot_dimension_numbers<[1], [0], [0], [1], [0, 0, 1, 1], [], []>} : vector<16x16xf32>, vector<16x16xf32>, vector<16x16xf32> -> vector<16x16xf32>
    %72 = tpu.concatenate %55, %71 in 1 : vector<16x16xf32>, vector<16x16xf32> -> vector<16x32xf32>
    %cst_22 = arith.constant dense<0.000000e+00> : vector<16x32xf32>
    %73 = tpu.matmul %72, %13, %cst_22 {dimension_numbers = #tpu.dot_dimension_numbers<[1], [0], [0], [1], [0, 0, 1, 1], [], []>} : vector<16x32xf32>, vector<32x32xf32>, vector<16x32xf32> -> vector<16x32xf32>
    %74 = arith.addf %8, %73 : vector<16x32xf32>
    %75 = vector.broadcast %14 : vector<1x32xf32> to vector<16x32xf32>
    %76 = arith.addf %74, %75 : vector<16x32xf32>
    %cst_23 = arith.constant dense<0.000000e+00> : vector<16xf32>
    %77 = vector.multi_reduction <add>, %76, %cst_23 [1] : vector<16x32xf32> to vector<16xf32>
    %78 = vector.shape_cast %77 : vector<16xf32> to vector<16x1xf32>
    %cst_24 = arith.constant 3.200000e+01 : f32
    %79 = vector.broadcast %cst_24 : f32 to vector<16x1xf32>
    %80 = arith.divf %78, %79 : vector<16x1xf32>
    %81 = vector.broadcast %80 : vector<16x1xf32> to vector<16x32xf32>
    %82 = arith.subf %76, %81 : vector<16x32xf32>
    %83 = arith.mulf %82, %82 : vector<16x32xf32>
    %cst_25 = arith.constant dense<0.000000e+00> : vector<16xf32>
    %84 = vector.multi_reduction <add>, %83, %cst_25 [1] : vector<16x32xf32> to vector<16xf32>
    %85 = vector.shape_cast %84 : vector<16xf32> to vector<16x1xf32>
    %cst_26 = arith.constant 3.200000e+01 : f32
    %86 = vector.broadcast %cst_26 : f32 to vector<16x1xf32>
    %87 = arith.divf %85, %86 : vector<16x1xf32>
    %88 = vector.broadcast %80 : vector<16x1xf32> to vector<16x32xf32>
    %89 = arith.subf %76, %88 : vector<16x32xf32>
    %cst_27 = arith.constant 9.99999997E-7 : f32
    %90 = vector.broadcast %cst_27 : f32 to vector<16x1xf32>
    %91 = arith.addf %87, %90 : vector<16x1xf32>
    %92 = math.rsqrt %91 : vector<16x1xf32>
    %93 = vector.broadcast %92 : vector<16x1xf32> to vector<16x32xf32>
    %94 = arith.mulf %89, %93 : vector<16x32xf32>
    %cst_28 = arith.constant dense<0.000000e+00> : vector<16x128xf32>
    %95 = tpu.matmul %94, %15, %cst_28 {dimension_numbers = #tpu.dot_dimension_numbers<[1], [0], [0], [1], [0, 0, 1, 1], [], []>} : vector<16x32xf32>, vector<32x128xf32>, vector<16x128xf32> -> vector<16x128xf32>
    %96 = vector.broadcast %16 : vector<1x128xf32> to vector<16x128xf32>
    %97 = arith.addf %95, %96 : vector<16x128xf32>
    %cst_29 = arith.constant 5.000000e-01 : f32
    %98 = vector.broadcast %cst_29 : f32 to vector<16x128xf32>
    %99 = arith.mulf %98, %97 : vector<16x128xf32>
    %cst_30 = arith.constant 0.707106769 : f32
    %100 = vector.broadcast %cst_30 : f32 to vector<16x128xf32>
    %101 = arith.mulf %97, %100 : vector<16x128xf32>
    %102 = math.absf %101 : vector<16x128xf32>
    %cst_31 = arith.constant 0.327591091 : f32
    %103 = vector.broadcast %cst_31 : f32 to vector<16x128xf32>
    %104 = arith.mulf %103, %102 : vector<16x128xf32>
    %cst_32 = arith.constant 1.000000e+00 : f32
    %105 = vector.broadcast %cst_32 : f32 to vector<16x128xf32>
    %106 = arith.addf %105, %104 : vector<16x128xf32>
    %cst_33 = arith.constant 1.000000e+00 : f32
    %107 = vector.broadcast %cst_33 : f32 to vector<16x128xf32>
    %108 = arith.divf %107, %106 : vector<16x128xf32>
    %cst_34 = arith.constant 1.06140542 : f32
    %109 = vector.broadcast %cst_34 : f32 to vector<16x128xf32>
    %110 = arith.mulf %108, %109 : vector<16x128xf32>
    %cst_35 = arith.constant -1.45315206 : f32
    %111 = vector.broadcast %cst_35 : f32 to vector<16x128xf32>
    %112 = arith.addf %111, %110 : vector<16x128xf32>
    %113 = arith.mulf %108, %112 : vector<16x128xf32>
    %cst_36 = arith.constant 1.42141378 : f32
    %114 = vector.broadcast %cst_36 : f32 to vector<16x128xf32>
    %115 = arith.addf %114, %113 : vector<16x128xf32>
    %116 = arith.mulf %108, %115 : vector<16x128xf32>
    %cst_37 = arith.constant -0.284496725 : f32
    %117 = vector.broadcast %cst_37 : f32 to vector<16x128xf32>
    %118 = arith.addf %117, %116 : vector<16x128xf32>
    %119 = arith.mulf %108, %118 : vector<16x128xf32>
    %cst_38 = arith.constant 0.254829586 : f32
    %120 = vector.broadcast %cst_38 : f32 to vector<16x128xf32>
    %121 = arith.addf %120, %119 : vector<16x128xf32>
    %122 = arith.mulf %108, %121 : vector<16x128xf32>
    %cst_39 = arith.constant 0.000000e+00 : f32
    %123 = vector.broadcast %cst_39 : f32 to vector<16x128xf32>
    %124 = arith.subf %123, %102 : vector<16x128xf32>
    %125 = arith.mulf %124, %102 : vector<16x128xf32>
    %126 = math.exp %125 : vector<16x128xf32>
    %127 = arith.mulf %122, %126 : vector<16x128xf32>
    %cst_40 = arith.constant 1.000000e+00 : f32
    %128 = vector.broadcast %cst_40 : f32 to vector<16x128xf32>
    %129 = arith.subf %128, %127 : vector<16x128xf32>
    %cst_41 = arith.constant 0.000000e+00 : f32
    %130 = vector.broadcast %cst_41 : f32 to vector<16x128xf32>
    %131 = arith.cmpf olt, %101, %130 : vector<16x128xf32>
    %cst_42 = arith.constant 0.000000e+00 : f32
    %132 = vector.broadcast %cst_42 : f32 to vector<16x128xf32>
    %133 = arith.subf %132, %129 : vector<16x128xf32>
    %134 = arith.select %131, %133, %129 : vector<16x128xi1>, vector<16x128xf32>
    %cst_43 = arith.constant 1.000000e+00 : f32
    %135 = vector.broadcast %cst_43 : f32 to vector<16x128xf32>
    %136 = arith.addf %135, %134 : vector<16x128xf32>
    %137 = arith.mulf %99, %136 : vector<16x128xf32>
    %cst_44 = arith.constant dense<0.000000e+00> : vector<16x32xf32>
    %138 = tpu.matmul %137, %17, %cst_44 {dimension_numbers = #tpu.dot_dimension_numbers<[1], [1], [0], [0], [0, 0, 1, 0], [], []>} : vector<16x128xf32>, vector<32x128xf32>, vector<16x32xf32> -> vector<16x32xf32>
    %139 = arith.addf %76, %138 : vector<16x32xf32>
    %140 = vector.broadcast %18 : vector<1x32xf32> to vector<16x32xf32>
    %141 = arith.addf %139, %140 : vector<16x32xf32>
    %c1 = arith.constant 1 : index
    %c0_45 = arith.constant 0 : index
    %c0_46 = arith.constant 0 : index
    %142 = vector.load %arg3[%c1, %c0_45, %c0_46] : memref<2x40x512xf32, #tpu.memory_space<vmem>>, vector<1x40x512xf32>
    %143 = vector.shape_cast %142 : vector<1x40x512xf32> to vector<40x512xf32>
    %144 = vector.extract_strided_slice %143 {offsets = [0, 0], sizes = [32, 96], strides = [1, 1]} : vector<40x512xf32> to vector<32x96xf32>
    %145 = vector.extract_strided_slice %143 {offsets = [32, 0], sizes = [1, 96], strides = [1, 1]} : vector<40x512xf32> to vector<1x96xf32>
    %146 = vector.extract_strided_slice %143 {offsets = [0, 128], sizes = [32, 32], strides = [1, 1]} : vector<40x512xf32> to vector<32x32xf32>
    %147 = vector.extract_strided_slice %143 {offsets = [32, 128], sizes = [1, 32], strides = [1, 1]} : vector<40x512xf32> to vector<1x32xf32>
    %148 = vector.extract_strided_slice %143 {offsets = [0, 256], sizes = [32, 128], strides = [1, 1]} : vector<40x512xf32> to vector<32x128xf32>
    %149 = vector.extract_strided_slice %143 {offsets = [32, 256], sizes = [1, 128], strides = [1, 1]} : vector<40x512xf32> to vector<1x128xf32>
    %150 = vector.extract_strided_slice %143 {offsets = [0, 384], sizes = [32, 128], strides = [1, 1]} : vector<40x512xf32> to vector<32x128xf32>
    %151 = vector.extract_strided_slice %143 {offsets = [32, 384], sizes = [1, 32], strides = [1, 1]} : vector<40x512xf32> to vector<1x32xf32>
    %cst_47 = arith.constant dense<0.000000e+00> : vector<16xf32>
    %152 = vector.multi_reduction <add>, %141, %cst_47 [1] : vector<16x32xf32> to vector<16xf32>
    %153 = vector.shape_cast %152 : vector<16xf32> to vector<16x1xf32>
    %cst_48 = arith.constant 3.200000e+01 : f32
    %154 = vector.broadcast %cst_48 : f32 to vector<16x1xf32>
    %155 = arith.divf %153, %154 : vector<16x1xf32>
    %156 = vector.broadcast %155 : vector<16x1xf32> to vector<16x32xf32>
    %157 = arith.subf %141, %156 : vector<16x32xf32>
    %158 = arith.mulf %157, %157 : vector<16x32xf32>
    %cst_49 = arith.constant dense<0.000000e+00> : vector<16xf32>
    %159 = vector.multi_reduction <add>, %158, %cst_49 [1] : vector<16x32xf32> to vector<16xf32>
    %160 = vector.shape_cast %159 : vector<16xf32> to vector<16x1xf32>
    %cst_50 = arith.constant 3.200000e+01 : f32
    %161 = vector.broadcast %cst_50 : f32 to vector<16x1xf32>
    %162 = arith.divf %160, %161 : vector<16x1xf32>
    %163 = vector.broadcast %155 : vector<16x1xf32> to vector<16x32xf32>
    %164 = arith.subf %141, %163 : vector<16x32xf32>
    %cst_51 = arith.constant 9.99999997E-7 : f32
    %165 = vector.broadcast %cst_51 : f32 to vector<16x1xf32>
    %166 = arith.addf %162, %165 : vector<16x1xf32>
    %167 = math.rsqrt %166 : vector<16x1xf32>
    %168 = vector.broadcast %167 : vector<16x1xf32> to vector<16x32xf32>
    %169 = arith.mulf %164, %168 : vector<16x32xf32>
    %cst_52 = arith.constant dense<0.000000e+00> : vector<16x96xf32>
    %170 = tpu.matmul %169, %144, %cst_52 {dimension_numbers = #tpu.dot_dimension_numbers<[1], [0], [0], [1], [0, 0, 1, 1], [], []>} : vector<16x32xf32>, vector<32x96xf32>, vector<16x96xf32> -> vector<16x96xf32>
    %171 = vector.broadcast %145 : vector<1x96xf32> to vector<16x96xf32>
    %172 = arith.addf %170, %171 : vector<16x96xf32>
    %173 = vector.extract_strided_slice %172 {offsets = [0, 0], sizes = [16, 16], strides = [1, 1]} : vector<16x96xf32> to vector<16x16xf32>
    %174 = vector.extract_strided_slice %172 {offsets = [0, 32], sizes = [16, 16], strides = [1, 1]} : vector<16x96xf32> to vector<16x16xf32>
    %175 = vector.extract_strided_slice %172 {offsets = [0, 64], sizes = [16, 16], strides = [1, 1]} : vector<16x96xf32> to vector<16x16xf32>
    %cst_53 = arith.constant dense<0.000000e+00> : vector<16x16xf32>
    %176 = tpu.matmul %173, %174, %cst_53 {dimension_numbers = #tpu.dot_dimension_numbers<[1], [1], [0], [0], [0, 0, 1, 0], [], []>} : vector<16x16xf32>, vector<16x16xf32>, vector<16x16xf32> -> vector<16x16xf32>
    %177 = vector.broadcast %4 : vector<1x16xf32> to vector<16x16xf32>
    %178 = arith.addf %176, %177 : vector<16x16xf32>
    %cst_54 = arith.constant dense<0xFF800000> : vector<16xf32>
    %179 = vector.multi_reduction <maximumf>, %178, %cst_54 [1] : vector<16x16xf32> to vector<16xf32>
    %180 = vector.shape_cast %179 : vector<16xf32> to vector<16x1xf32>
    %181 = vector.broadcast %180 : vector<16x1xf32> to vector<16x16xf32>
    %182 = arith.subf %178, %181 : vector<16x16xf32>
    %183 = math.exp %182 : vector<16x16xf32>
    %cst_55 = arith.constant dense<0.000000e+00> : vector<16xf32>
    %184 = vector.multi_reduction <add>, %183, %cst_55 [1] : vector<16x16xf32> to vector<16xf32>
    %185 = vector.shape_cast %184 : vector<16xf32> to vector<16x1xf32>
    %186 = vector.broadcast %185 : vector<16x1xf32> to vector<16x16xf32>
    %187 = arith.divf %183, %186 : vector<16x16xf32>
    %cst_56 = arith.constant dense<0.000000e+00> : vector<16x16xf32>
    %188 = tpu.matmul %187, %175, %cst_56 {dimension_numbers = #tpu.dot_dimension_numbers<[1], [0], [0], [1], [0, 0, 1, 1], [], []>} : vector<16x16xf32>, vector<16x16xf32>, vector<16x16xf32> -> vector<16x16xf32>
    %189 = vector.extract_strided_slice %172 {offsets = [0, 16], sizes = [16, 16], strides = [1, 1]} : vector<16x96xf32> to vector<16x16xf32>
    %190 = vector.extract_strided_slice %172 {offsets = [0, 48], sizes = [16, 16], strides = [1, 1]} : vector<16x96xf32> to vector<16x16xf32>
    %191 = vector.extract_strided_slice %172 {offsets = [0, 80], sizes = [16, 16], strides = [1, 1]} : vector<16x96xf32> to vector<16x16xf32>
    %cst_57 = arith.constant dense<0.000000e+00> : vector<16x16xf32>
    %192 = tpu.matmul %189, %190, %cst_57 {dimension_numbers = #tpu.dot_dimension_numbers<[1], [1], [0], [0], [0, 0, 1, 0], [], []>} : vector<16x16xf32>, vector<16x16xf32>, vector<16x16xf32> -> vector<16x16xf32>
    %193 = vector.broadcast %4 : vector<1x16xf32> to vector<16x16xf32>
    %194 = arith.addf %192, %193 : vector<16x16xf32>
    %cst_58 = arith.constant dense<0xFF800000> : vector<16xf32>
    %195 = vector.multi_reduction <maximumf>, %194, %cst_58 [1] : vector<16x16xf32> to vector<16xf32>
    %196 = vector.shape_cast %195 : vector<16xf32> to vector<16x1xf32>
    %197 = vector.broadcast %196 : vector<16x1xf32> to vector<16x16xf32>
    %198 = arith.subf %194, %197 : vector<16x16xf32>
    %199 = math.exp %198 : vector<16x16xf32>
    %cst_59 = arith.constant dense<0.000000e+00> : vector<16xf32>
    %200 = vector.multi_reduction <add>, %199, %cst_59 [1] : vector<16x16xf32> to vector<16xf32>
    %201 = vector.shape_cast %200 : vector<16xf32> to vector<16x1xf32>
    %202 = vector.broadcast %201 : vector<16x1xf32> to vector<16x16xf32>
    %203 = arith.divf %199, %202 : vector<16x16xf32>
    %cst_60 = arith.constant dense<0.000000e+00> : vector<16x16xf32>
    %204 = tpu.matmul %203, %191, %cst_60 {dimension_numbers = #tpu.dot_dimension_numbers<[1], [0], [0], [1], [0, 0, 1, 1], [], []>} : vector<16x16xf32>, vector<16x16xf32>, vector<16x16xf32> -> vector<16x16xf32>
    %205 = tpu.concatenate %188, %204 in 1 : vector<16x16xf32>, vector<16x16xf32> -> vector<16x32xf32>
    %cst_61 = arith.constant dense<0.000000e+00> : vector<16x32xf32>
    %206 = tpu.matmul %205, %146, %cst_61 {dimension_numbers = #tpu.dot_dimension_numbers<[1], [0], [0], [1], [0, 0, 1, 1], [], []>} : vector<16x32xf32>, vector<32x32xf32>, vector<16x32xf32> -> vector<16x32xf32>
    %207 = arith.addf %141, %206 : vector<16x32xf32>
    %208 = vector.broadcast %147 : vector<1x32xf32> to vector<16x32xf32>
    %209 = arith.addf %207, %208 : vector<16x32xf32>
    %cst_62 = arith.constant dense<0.000000e+00> : vector<16xf32>
    %210 = vector.multi_reduction <add>, %209, %cst_62 [1] : vector<16x32xf32> to vector<16xf32>
    %211 = vector.shape_cast %210 : vector<16xf32> to vector<16x1xf32>
    %cst_63 = arith.constant 3.200000e+01 : f32
    %212 = vector.broadcast %cst_63 : f32 to vector<16x1xf32>
    %213 = arith.divf %211, %212 : vector<16x1xf32>
    %214 = vector.broadcast %213 : vector<16x1xf32> to vector<16x32xf32>
    %215 = arith.subf %209, %214 : vector<16x32xf32>
    %216 = arith.mulf %215, %215 : vector<16x32xf32>
    %cst_64 = arith.constant dense<0.000000e+00> : vector<16xf32>
    %217 = vector.multi_reduction <add>, %216, %cst_64 [1] : vector<16x32xf32> to vector<16xf32>
    %218 = vector.shape_cast %217 : vector<16xf32> to vector<16x1xf32>
    %cst_65 = arith.constant 3.200000e+01 : f32
    %219 = vector.broadcast %cst_65 : f32 to vector<16x1xf32>
    %220 = arith.divf %218, %219 : vector<16x1xf32>
    %221 = vector.broadcast %213 : vector<16x1xf32> to vector<16x32xf32>
    %222 = arith.subf %209, %221 : vector<16x32xf32>
    %cst_66 = arith.constant 9.99999997E-7 : f32
    %223 = vector.broadcast %cst_66 : f32 to vector<16x1xf32>
    %224 = arith.addf %220, %223 : vector<16x1xf32>
    %225 = math.rsqrt %224 : vector<16x1xf32>
    %226 = vector.broadcast %225 : vector<16x1xf32> to vector<16x32xf32>
    %227 = arith.mulf %222, %226 : vector<16x32xf32>
    %cst_67 = arith.constant dense<0.000000e+00> : vector<16x128xf32>
    %228 = tpu.matmul %227, %148, %cst_67 {dimension_numbers = #tpu.dot_dimension_numbers<[1], [0], [0], [1], [0, 0, 1, 1], [], []>} : vector<16x32xf32>, vector<32x128xf32>, vector<16x128xf32> -> vector<16x128xf32>
    %229 = vector.broadcast %149 : vector<1x128xf32> to vector<16x128xf32>
    %230 = arith.addf %228, %229 : vector<16x128xf32>
    %cst_68 = arith.constant 5.000000e-01 : f32
    %231 = vector.broadcast %cst_68 : f32 to vector<16x128xf32>
    %232 = arith.mulf %231, %230 : vector<16x128xf32>
    %cst_69 = arith.constant 0.707106769 : f32
    %233 = vector.broadcast %cst_69 : f32 to vector<16x128xf32>
    %234 = arith.mulf %230, %233 : vector<16x128xf32>
    %235 = math.absf %234 : vector<16x128xf32>
    %cst_70 = arith.constant 0.327591091 : f32
    %236 = vector.broadcast %cst_70 : f32 to vector<16x128xf32>
    %237 = arith.mulf %236, %235 : vector<16x128xf32>
    %cst_71 = arith.constant 1.000000e+00 : f32
    %238 = vector.broadcast %cst_71 : f32 to vector<16x128xf32>
    %239 = arith.addf %238, %237 : vector<16x128xf32>
    %cst_72 = arith.constant 1.000000e+00 : f32
    %240 = vector.broadcast %cst_72 : f32 to vector<16x128xf32>
    %241 = arith.divf %240, %239 : vector<16x128xf32>
    %cst_73 = arith.constant 1.06140542 : f32
    %242 = vector.broadcast %cst_73 : f32 to vector<16x128xf32>
    %243 = arith.mulf %241, %242 : vector<16x128xf32>
    %cst_74 = arith.constant -1.45315206 : f32
    %244 = vector.broadcast %cst_74 : f32 to vector<16x128xf32>
    %245 = arith.addf %244, %243 : vector<16x128xf32>
    %246 = arith.mulf %241, %245 : vector<16x128xf32>
    %cst_75 = arith.constant 1.42141378 : f32
    %247 = vector.broadcast %cst_75 : f32 to vector<16x128xf32>
    %248 = arith.addf %247, %246 : vector<16x128xf32>
    %249 = arith.mulf %241, %248 : vector<16x128xf32>
    %cst_76 = arith.constant -0.284496725 : f32
    %250 = vector.broadcast %cst_76 : f32 to vector<16x128xf32>
    %251 = arith.addf %250, %249 : vector<16x128xf32>
    %252 = arith.mulf %241, %251 : vector<16x128xf32>
    %cst_77 = arith.constant 0.254829586 : f32
    %253 = vector.broadcast %cst_77 : f32 to vector<16x128xf32>
    %254 = arith.addf %253, %252 : vector<16x128xf32>
    %255 = arith.mulf %241, %254 : vector<16x128xf32>
    %cst_78 = arith.constant 0.000000e+00 : f32
    %256 = vector.broadcast %cst_78 : f32 to vector<16x128xf32>
    %257 = arith.subf %256, %235 : vector<16x128xf32>
    %258 = arith.mulf %257, %235 : vector<16x128xf32>
    %259 = math.exp %258 : vector<16x128xf32>
    %260 = arith.mulf %255, %259 : vector<16x128xf32>
    %cst_79 = arith.constant 1.000000e+00 : f32
    %261 = vector.broadcast %cst_79 : f32 to vector<16x128xf32>
    %262 = arith.subf %261, %260 : vector<16x128xf32>
    %cst_80 = arith.constant 0.000000e+00 : f32
    %263 = vector.broadcast %cst_80 : f32 to vector<16x128xf32>
    %264 = arith.cmpf olt, %234, %263 : vector<16x128xf32>
    %cst_81 = arith.constant 0.000000e+00 : f32
    %265 = vector.broadcast %cst_81 : f32 to vector<16x128xf32>
    %266 = arith.subf %265, %262 : vector<16x128xf32>
    %267 = arith.select %264, %266, %262 : vector<16x128xi1>, vector<16x128xf32>
    %cst_82 = arith.constant 1.000000e+00 : f32
    %268 = vector.broadcast %cst_82 : f32 to vector<16x128xf32>
    %269 = arith.addf %268, %267 : vector<16x128xf32>
    %270 = arith.mulf %232, %269 : vector<16x128xf32>
    %cst_83 = arith.constant dense<0.000000e+00> : vector<16x32xf32>
    %271 = tpu.matmul %270, %150, %cst_83 {dimension_numbers = #tpu.dot_dimension_numbers<[1], [1], [0], [0], [0, 0, 1, 0], [], []>} : vector<16x128xf32>, vector<32x128xf32>, vector<16x32xf32> -> vector<16x32xf32>
    %272 = arith.addf %209, %271 : vector<16x32xf32>
    %273 = vector.broadcast %151 : vector<1x32xf32> to vector<16x32xf32>
    %274 = arith.addf %272, %273 : vector<16x32xf32>
    %cst_84 = arith.constant dense<0.000000e+00> : vector<16xf32>
    %275 = vector.multi_reduction <add>, %274, %cst_84 [1] : vector<16x32xf32> to vector<16xf32>
    %276 = vector.shape_cast %275 : vector<16xf32> to vector<16x1xf32>
    %cst_85 = arith.constant 3.200000e+01 : f32
    %277 = vector.broadcast %cst_85 : f32 to vector<16x1xf32>
    %278 = arith.divf %276, %277 : vector<16x1xf32>
    %279 = vector.broadcast %278 : vector<16x1xf32> to vector<16x32xf32>
    %280 = arith.subf %274, %279 : vector<16x32xf32>
    %281 = arith.mulf %280, %280 : vector<16x32xf32>
    %cst_86 = arith.constant dense<0.000000e+00> : vector<16xf32>
    %282 = vector.multi_reduction <add>, %281, %cst_86 [1] : vector<16x32xf32> to vector<16xf32>
    %283 = vector.shape_cast %282 : vector<16xf32> to vector<16x1xf32>
    %cst_87 = arith.constant 3.200000e+01 : f32
    %284 = vector.broadcast %cst_87 : f32 to vector<16x1xf32>
    %285 = arith.divf %283, %284 : vector<16x1xf32>
    %286 = vector.broadcast %278 : vector<16x1xf32> to vector<16x32xf32>
    %287 = arith.subf %274, %286 : vector<16x32xf32>
    %cst_88 = arith.constant 9.99999997E-7 : f32
    %288 = vector.broadcast %cst_88 : f32 to vector<16x1xf32>
    %289 = arith.addf %285, %288 : vector<16x1xf32>
    %290 = math.rsqrt %289 : vector<16x1xf32>
    %291 = vector.broadcast %290 : vector<16x1xf32> to vector<16x32xf32>
    %292 = arith.mulf %287, %291 : vector<16x32xf32>
    %293 = vector.broadcast %2 : vector<1x32xf32> to vector<16x32xf32>
    %294 = arith.mulf %292, %293 : vector<16x32xf32>
    %295 = vector.broadcast %3 : vector<1x32xf32> to vector<16x32xf32>
    %296 = arith.addf %294, %295 : vector<16x32xf32>
    %c0_89 = arith.constant 0 : index
    %c0_90 = arith.constant 0 : index
    %297 = vector.load %arg5[%c0_89, %c0_90] : memref<16x32xf32, #tpu.memory_space<vmem>>, vector<16x32xf32>
    tpu.vector_store %arg5[%c0_89, %c0_90], %296 {strides = array<i32>} : memref<16x32xf32, #tpu.memory_space<vmem>>, vector<16x32xf32>,
    return
  }
  func.func @transform_0(%arg0: i32) -> (i32, i32) {
    %c0_i32 = arith.constant 0 : i32
    %c0_i32_0 = arith.constant 0 : i32
    return %arg0, %c0_i32 : i32, i32
  }
  func.func @transform_1(%arg0: i32) -> (i32, i32) {
    %c0_i32 = arith.constant 0 : i32
    %c0_i32_0 = arith.constant 0 : i32
    %c0_i32_1 = arith.constant 0 : i32
    return %c0_i32, %c0_i32_0 : i32, i32
  }
  func.func @transform_2(%arg0: i32) -> (i32, i32, i32) {
    %c0_i32 = arith.constant 0 : i32
    %c0_i32_0 = arith.constant 0 : i32
    %c0_i32_1 = arith.constant 0 : i32
    %c0_i32_2 = arith.constant 0 : i32
    return %c0_i32, %c0_i32_0, %c0_i32_1 : i32, i32, i32
  }
  func.func @transform_3(%arg0: i32) -> (i32, i32) {
    %c0_i32 = arith.constant 0 : i32
    %c0_i32_0 = arith.constant 0 : i32
    %c0_i32_1 = arith.constant 0 : i32
    return %c0_i32, %c0_i32_0 : i32, i32
  }
  func.func @transform_4(%arg0: i32) -> (i32, i32) {
    %c0_i32 = arith.constant 0 : i32
    %c0_i32_0 = arith.constant 0 : i32
    return %arg0, %c0_i32 : i32, i32
  }
}

</mosaic_0001>

<bundles_post_ra>
// kernel: dinov2_robustifier_forward.1
= control target key start
LH: loop header
LB: loop body
LE: loop exit
PB: predicated region body
PF: predicated region fallthrough
CT: control target
= control target key end

     0   :  { %s3163_s15 = smov 0   ;;  %s3760_s0 = inlined_call_operand.vmem [shape: f32[32,640], index: 0, kind: input, shape index: {}]   ;;  %s3761_s1 = inlined_call_operand.vmem [shape: f32[640,32], index: 1, kind: input, shape index: {}]   ;;  %s3762_s2 = inlined_call_operand.vmem [shape: f32[2,40,512], index: 2, kind: input, shape index: {}]   ;;  %s3763_s3 = inlined_call_operand.vmem [shape: f32[19,32], index: 3, kind: input, shape index: {}]   ;;  %s3764_s4 = inlined_call_operand.vmem [shape: f32[32,32], index: 4, kind: output, shape index: {}]  }
   0x1 LB: > { %s2380_s16 = sadd.s32 4294967295, %s3130_s15   ;;  %p2384_p0 = scmp.ge.s32.totalorder %s3130_s15, 1  ;;  %s3130_s15 = sphi %s3163_s15, %s14_s15  }
   0x2   : > { %p164_p1 = scmp.lt.s32.totalorder %s3130_s15, 3 }
   0x4   : > { %p165_p2 = pnand %p2384_p0, %p164_p1 }
   0x5   : > { %v233_v0 = vld [vmem:[%s3761_s1 + $0x80] sm:$0xff] (!%p165_p2)  ;;  %v234_v1 = vld [vmem:[%s3761_s1 + $0x88] sm:$0xff] (!%p165_p2)  ;;  %v235_v11 = vld [vmem:[%s3761_s1 + $0x90] sm:$0xff] (!%p165_p2)  ;;  %s3207_s17 = sshll.u32 (!%p165_p2), %s2380_s16, 1  ;;  %vm544_vm0 = vcmask (!%p165_p2), 261120   ;;  %vm667_vm1 = vcmask (!%p165_p2), 130048  }
   0x6   : > { %168 = sbr.rel (%p165_p2) target bundleno = 6220 (0x184c), region = 36  ;;  %v265_v2 = vld [vmem:[%s3761_s1 + $0x180] sm:$0xff] (!%p165_p2)  ;;  %v2800_v3 = vpack.c.bf16 (!%p165_p2), %v234_v1, %v233_v0  ;;  %v266_v4 = vld [vmem:[%s3761_s1 + $0x188] sm:$0xff] (!%p165_p2)  ;;  %v236_v13 = vld [vmem:[%s3761_s1 + $0x98] sm:$0xff] (!%p165_p2)  ;;  %p192_p3 = scmp.lt.s32.totalorder (!%p165_p2), %s3207_s17, 3 }
   0x7   : > { %v217_v5 = vld [vmem:[%s3761_s1] sm:$0xff] (!%p165_p2)  ;;  %v218_v6 = vld [vmem:[%s3761_s1 + $0x8] sm:$0xff] (!%p165_p2)  ;;  %v2832_v7 = vpack.c.bf16 (!%p165_p2), %v266_v4, %v265_v2  ;;  %v267_v14 = vld [vmem:[%s3761_s1 + $0x190] sm:$0xff] (!%p165_p2)  ;;  %v2804_v16 = vpack.c.bf16 (!%p165_p2), %v236_v13, %v235_v11  ;;  %s3132_s30 = smov (!%p165_p2), 96   ;;  %s3133_s5 = smov (!%p165_p2), 80  }
   0x8   : > { %v2802_v8 = vpack.c.bf16 (!%p165_p2), %v218_v6, %v217_v5  ;;  %v249_v9 = vld [vmem:[%s3761_s1 + $0x100] sm:$0xff] (!%p165_p2)  ;;  %v250_v10 = vld [vmem:[%s3761_s1 + $0x108] sm:$0xff] (!%p165_p2)  ;;  %2801 = vmatprep.subr.bf16.mxu0 (!%p165_p2), %v2800_v3  ;;  %v268_v15 = vld [vmem:[%s3761_s1 + $0x198] sm:$0xff] (!%p165_p2)  ;;  %s3134_s6 = smov (!%p165_p2), 112   ;;  %s3135_s8 = smov (!%p165_p2), 64  }
   0x9   : > { %v2834_v12 = vpack.c.bf16 (!%p165_p2), %v250_v10, %v249_v9  ;;  %2833 = vmatprep.subr.bf16.mxu1 (!%p165_p2), %v2832_v7  ;;  %v2836_v17 = vpack.c.bf16 (!%p165_p2), %v268_v15, %v267_v14  ;;  %v219_v18 = vld [vmem:[%s3761_s1 + $0x10] sm:$0xff] (!%p165_p2)  ;;  %v220_v19 = vld [vmem:[%s3761_s1 + $0x18] sm:$0xff] (!%p165_p2)  ;;  %v237_v23 = vld [vmem:[%s3761_s1 + $0xa0] sm:$0xff] (!%p165_p2)  ;;  %s3136_s9 = smov (!%p165_p2), 48   ;;  %s3137_s20 = smov (!%p165_p2), 16  }
   0xa   : > { %2803 = vmatpush3.bf16.msra.mxu0 (!%p165_p2), %v2802_v8  ;;  %v251_v20 = vld [vmem:[%s3761_s1 + $0x110] sm:$0xff] (!%p165_p2)  ;;  %v2806_v21 = vpack.c.bf16 (!%p165_p2), %v220_v19, %v219_v18  ;;  %v252_v22 = vld [vmem:[%s3761_s1 + $0x118] sm:$0xff] (!%p165_p2)  ;;  %v238_v24 = vld [vmem:[%s3761_s1 + $0xa8] sm:$0xff] (!%p165_p2) }
   0xb   : > { %2835 = vmatpush3.bf16.msra.mxu1 (!%p165_p2), %v2834_v12  ;;  %2805 = vmatprep.subr.bf16.mxu0 (!%p165_p2), %v2804_v16  ;;  %v2838_v25 = vpack.c.bf16 (!%p165_p2), %v252_v22, %v251_v20  ;;  %v2808_v26 = vpack.c.bf16 (!%p165_p2), %v238_v24, %v237_v23  ;;  %v269_v27 = vld [vmem:[%s3761_s1 + $0x1a0] sm:$0xff] (!%p165_p2)  ;;  %v270_v28 = vld [vmem:[%s3761_s1 + $0x1a8] sm:$0xff] (!%p165_p2)  ;;  %v239_v35 = vld [vmem:[%s3761_s1 + $0xb0] sm:$0xff] (!%p165_p2) }
   0xc   : > { %2837 = vmatprep.subr.bf16.mxu1 (!%p165_p2), %v2836_v17  ;;  %v221_v29 = vld [vmem:[%s3761_s1 + $0x20] sm:$0xff] (!%p165_p2)  ;;  %v2840_v30 = vpack.c.bf16 (!%p165_p2), %v270_v28, %v269_v27  ;;  %v222_v31 = vld [vmem:[%s3761_s1 + $0x28] sm:$0xff] (!%p165_p2)  ;;  %v240_v36 = vld [vmem:[%s3761_s1 + $0xb8] sm:$0xff] (!%p165_p2) }
   0xd   : > { %v253_v32 = vld [vmem:[%s3761_s1 + $0x120] sm:$0xff]  ;;  %v254_v33 = vld [vmem:[%s3761_s1 + $0x128] sm:$0xff]  ;;  %v2810_v34 = vpack.c.bf16 %v222_v31, %v221_v29  ;;  %v271_v37 = vld [vmem:[%s3761_s1 + $0x1b0] sm:$0xff]  ;;  %v2812_v39 = vpack.c.bf16 %v240_v36, %v239_v35  ;;  %s3768_s17 = smov (!%p192_p3, %s3207_s17), 3 }
   0xe   : > { %2807 = vmatpush3.bf16.msra.mxu0 %v2806_v21  ;;  %v2842_v38 = vpack.c.bf16 %v254_v33, %v253_v32  ;;  %v272_v40 = vld [vmem:[%s3761_s1 + $0x1b8] sm:$0xff]  ;;  %v223_v41 = vld [vmem:[%s3761_s1 + $0x30] sm:$0xff]  ;;  %v241_v46 = vld [vmem:[%s3761_s1 + $0xc0] sm:$0xff]  ;;  %s3000_s29 = smul.u32 40, %s3768_s17  ;;  %s2388_s19 = sshll.u32 %s3768_s17, 3 }
   0xf   : > { %2839 = vmatpush3.bf16.msra.mxu1 %v2838_v25  ;;  %2809 = vmatprep.subr.bf16.mxu0 %v2808_v26  ;;  %v224_v42 = vld [vmem:[%s3761_s1 + $0x38] sm:$0xff]  ;;  %v2844_v43 = vpack.c.bf16 %v272_v40, %v271_v37  ;;  %v255_v44 = vld [vmem:[%s3761_s1 + $0x130] sm:$0xff]  ;;  %v242_v47 = vld [vmem:[%s3761_s1 + $0xc8] sm:$0xff]  ;;  %s202_s22 = scalar_lea.vmem %s3764_s4, %s2388_s19 }
  0x10   : > { %2841 = vmatprep.subr.bf16.mxu1 %v2840_v30  ;;  %v256_v45 = vld [vmem:[%s3761_s1 + $0x138] sm:$0xff]  ;;  %v273_v48 = vld [vmem:[%s3761_s1 + $0x1c0] sm:$0xff]  ;;  %v274_v49 = vld [vmem:[%s3761_s1 + $0x1c8] sm:$0xff]  ;;  %v2814_v50 = vpack.c.bf16 %v224_v42, %v223_v41  ;;  %v2816_v52 = vpack.c.bf16 %v242_v47, %v241_v46  ;;  %s3333_s24 = scalar_lea.vmem %s3760_s0, %s3000_s29 }
  0x11   : > { %v2846_v51 = vpack.c.bf16 %v256_v45, %v255_v44  ;;  %v225_v53 = vld [vmem:[%s3761_s1 + $0x40] sm:$0xff]  ;;  %v226_v54 = vld [vmem:[%s3761_s1 + $0x48] sm:$0xff]  ;;  %v2848_v56 = vpack.c.bf16 %v274_v49, %v273_v48  ;;  %v243_v58 = vld [vmem:[%s3761_s1 + $0xd0] sm:$0xff] }
  0x12   : > { %2811 = vmatpush3.bf16.msra.mxu0 %v2810_v34  ;;  %v257_v55 = vld [vmem:[%s3761_s1 + $0x140] sm:$0xff]  ;;  %v258_v57 = vld [vmem:[%s3761_s1 + $0x148] sm:$0xff]  ;;  %v244_v59 = vld [vmem:[%s3761_s1 + $0xd8] sm:$0xff]  ;;  %v2818_v62 = vpack.c.bf16 %v226_v54, %v225_v53 }
  0x13   : > { %2843 = vmatpush3.bf16.msra.mxu1 %v2842_v38  ;;  %2813 = vmatprep.subr.bf16.mxu0 %v2812_v39  ;;  %v275_v60 = vld [vmem:[%s3761_s1 + $0x1d0] sm:$0xff]  ;;  %v276_v61 = vld [vmem:[%s3761_s1 + $0x1d8] sm:$0xff]  ;;  %v2850_v63 = vpack.c.bf16 %v258_v57, %v257_v55  ;;  %v2820_v0 = vpack.c.bf16 %v244_v59, %v243_v58  ;;  %v245_v6 = vld [vmem:[%s3761_s1 + $0xe0] sm:$0xff] }
  0x14   : > { %2845 = vmatprep.subr.bf16.mxu1 %v2844_v43  ;;  %v227_v1 = vld [vmem:[%s3761_s1 + $0x50] sm:$0xff]  ;;  %v228_v2 = vld [vmem:[%s3761_s1 + $0x58] sm:$0xff]  ;;  %v2852_v4 = vpack.c.bf16 %v276_v61, %v275_v60  ;;  %v246_v7 = vld [vmem:[%s3761_s1 + $0xe8] sm:$0xff] }
  0x15   : > { %v259_v3 = vld [vmem:[%s3761_s1 + $0x150] sm:$0xff]  ;;  %v260_v5 = vld [vmem:[%s3761_s1 + $0x158] sm:$0xff]  ;;  %v277_v8 = vld [vmem:[%s3761_s1 + $0x1e0] sm:$0xff]  ;;  %v2822_v10 = vpack.c.bf16 %v228_v2, %v227_v1  ;;  %v2824_v14 = vpack.c.bf16 %v246_v7, %v245_v6 }
  0x16   : > { %2815 = vmatpush3.bf16.msra.mxu0 %v2814_v50  ;;  %v278_v9 = vld [vmem:[%s3761_s1 + $0x1e8] sm:$0xff]  ;;  %v229_v11 = vld [vmem:[%s3761_s1 + $0x60] sm:$0xff]  ;;  %v2854_v13 = vpack.c.bf16 %v260_v5, %v259_v3  ;;  %v210_v17 = vld [vmem:[%s3333_s24 + $0x18] sm:$0xff] }
  0x17   : > { %2847 = vmatpush3.bf16.msra.mxu1 %v2846_v51  ;;  %2817 = vmatprep.subr.bf16.mxu0 %v2816_v52  ;;  %v230_v12 = vld [vmem:[%s3761_s1 + $0x68] sm:$0xff]  ;;  %v261_v15 = vld [vmem:[%s3761_s1 + $0x160] sm:$0xff]  ;;  %v2856_v18 = vpack.c.bf16 %v278_v9, %v277_v8  ;;  %v247_v20 = vld [vmem:[%s3761_s1 + $0xf0] sm:$0xff] }
  0x18   : > { %2849 = vmatprep.subr.bf16.mxu1 %v2848_v56  ;;  %v208_v16 = vld [vmem:[%s3333_s24 + $0x8] sm:$0xff]  ;;  %v248_v21 = vld [vmem:[%s3761_s1 + $0xf8] sm:$0xff]  ;;  %v279_v22 = vld [vmem:[%s3761_s1 + $0x1f0] sm:$0xff]  ;;  %436 = vmatprep.mubr.f32.mxu1 %v210_v17  ;;  %v2826_v24 = vpack.c.bf16 %v230_v12, %v229_v11 }
  0x19   : > { %v262_v19 = vld [vmem:[%s3761_s1 + $0x168] sm:$0xff]  ;;  %361 = vmatprep.mubr.f32.mxu0 %v208_v16  ;;  %v280_v23 = vld [vmem:[%s3761_s1 + $0x1f8] sm:$0xff]  ;;  %v2828_v26 = vpack.c.bf16 %v248_v21, %v247_v20  ;;  %v231_v27 = vld [vmem:[%s3761_s1 + $0x70] sm:$0xff] }
  0x1a   : > { %2819 = vmatpush3.bf16.msra.mxu0 %v2818_v62  ;;  %v2858_v25 = vpack.c.bf16 %v262_v19, %v261_v15  ;;  %v232_v28 = vld [vmem:[%s3761_s1 + $0x78] sm:$0xff]  ;;  %v263_v29 = vld [vmem:[%s3761_s1 + $0x170] sm:$0xff]  ;;  %v2860_v30 = vpack.c.bf16 %v280_v23, %v279_v22  ;;  %v281_v32 = vld [vmem:[%s3761_s1 + $0x200] sm:$0xff] }
  0x1b   : > { %2851 = vmatpush3.bf16.msra.mxu1 %v2850_v63  ;;  %2821 = vmatprep.subr.bf16.mxu0 %v2820_v0  ;;  %v264_v31 = vld [vmem:[%s3761_s1 + $0x178] sm:$0xff]  ;;  %v282_v33 = vld [vmem:[%s3761_s1 + $0x208] sm:$0xff]  ;;  %v2830_v34 = vpack.c.bf16 %v232_v28, %v231_v27  ;;  %v283_v37 = vld [vmem:[%s3761_s1 + $0x210] sm:$0xff] }
  0x1c   : > { %2853 = vmatprep.subr.bf16.mxu1 %v2852_v4  ;;  %v2862_v35 = vpack.c.bf16 %v264_v31, %v263_v29  ;;  %v2864_v36 = vpack.c.bf16 %v282_v33, %v281_v32  ;;  %v284_v38 = vld [vmem:[%s3761_s1 + $0x218] sm:$0xff]  ;;  %v207_v39 = vld [vmem:[%s3333_s24] sm:$0xff]  ;;  %v209_v40 = vld [vmem:[%s3333_s24 + $0x10] sm:$0xff] }
  0x1d   : > { %v2868_v41 = vpack.c.bf16 %v284_v38, %v283_v37  ;;  %v285_v42 = vld [vmem:[%s3761_s1 + $0x220] sm:$0xff]  ;;  %v286_v43 = vld [vmem:[%s3761_s1 + $0x228] sm:$0xff]  ;;  %v213_v44 = vld [vmem:[%s3333_s24 + $0x30] sm:$0xff] }
  0x1e   : > { %2823 = vmatpush3.bf16.msra.mxu0 %v2822_v10  ;;  %v215_v45 = vld [vmem:[%s3333_s24 + $0x40] sm:$0xff]  ;;  %v212_v46 = vld [vmem:[%s3333_s24 + $0x28] sm:$0xff]  ;;  %v2872_v47 = vpack.c.bf16 %v286_v43, %v285_v42  ;;  %v214_v48 = vld [vmem:[%s3333_s24 + $0x38] sm:$0xff] }
  0x1f   : > { %2855 = vmatpush3.bf16.msra.mxu1 %v2854_v13  ;;  %2825 = vmatprep.subr.bf16.mxu0 %v2824_v14  ;;  %v287_v49 = vld [vmem:[%s3761_s1 + $0x230] sm:$0xff]  ;;  %v288_v50 = vld [vmem:[%s3761_s1 + $0x238] sm:$0xff]  ;;  %v211_v51 = vld [vmem:[%s3333_s24 + $0x20] sm:$0xff] }
  0x20   : > { %2857 = vmatprep.subr.bf16.mxu1 %v2856_v18  ;;  %v2876_v52 = vpack.c.bf16 %v288_v50, %v287_v49  ;;  %v289_v53 = vld [vmem:[%s3761_s1 + $0x240] sm:$0xff]  ;;  %v290_v54 = vld [vmem:[%s3761_s1 + $0x248] sm:$0xff]  ;;  %v291_v56 = vld [vmem:[%s3761_s1 + $0x250] sm:$0xff] }
  0x21   : > { %v2880_v55 = vpack.c.bf16 %v290_v54, %v289_v53  ;;  %v292_v57 = vld [vmem:[%s3761_s1 + $0x258] sm:$0xff]  ;;  %v293_v59 = vld [vmem:[%s3761_s1 + $0x260] sm:$0xff]  ;;  %v294_v60 = vld [vmem:[%s3761_s1 + $0x268] sm:$0xff] }
  0x22   : > { %2827 = vmatpush3.bf16.msra.mxu0 %v2826_v24  ;;  %v2884_v58 = vpack.c.bf16 %v292_v57, %v291_v56  ;;  %v2888_v61 = vpack.c.bf16 %v294_v60, %v293_v59  ;;  %v295_v62 = vld [vmem:[%s3761_s1 + $0x270] sm:$0xff]  ;;  %v296_v63 = vld [vmem:[%s3761_s1 + $0x278] sm:$0xff]  ;;  %v216_v1 = vld [vmem:[%s3333_s24 + $0x48] sm:$0xff] }
  0x23   : > { %2859 = vmatpush3.bf16.msra.mxu1 %v2858_v25  ;;  %2829 = vmatprep.subr.bf16.mxu0 %v2828_v26  ;;  %v2892_v0 = vpack.c.bf16 %v296_v63, %v295_v62  ;;  %v204_v18 = vld [vmem:[%s3763_s3] sm:$0xff]  ;;  %v205_v21 = vld [vmem:[%s3763_s3 + $0x8] sm:$0xff]  ;;  %vm3487_vm2 = vmpackc.low %vm667_vm1, %vm667_vm1 }
  0x24   : > { %2861 = vmatprep.subr.bf16.mxu1 %v2860_v30  ;;  %v528_v37 = vld [vmem:[%s3762_s2 + $0x20] sm:$0xff] }
  0x26   : > { %2831 = vmatpush3.bf16.msra.mxu0 %v2830_v34 }
  0x27   : > { %2863 = vmatpush3.bf16.msra.mxu1 %v2862_v35  ;;  %2865 = vmatprep.subr.bf16.mxu0 %v2864_v36 }
  0x29   : > { %362 = vmatmul.mubr.f32.vlgmr.msra.gmra.mrb[0].mxu0 %v207_v39  ;;  %v532_v39 = vld [vmem:[%s3762_s2 + $0x40] sm:$0xff] }
  0x2a   : > { %437 = vmatmul.mubr.f32.vlgmr.msra.gmra.mrb[0].mxu1 %v209_v40  ;;  %2867 = vmatpush3.bf16.msra.mxu0 %v2864_v36  ;;  %v524_v36 = vld [vmem:[%s3762_s2] sm:$0xff] }
  0x2b   : > { %2869 = vmatprep.subr.bf16.mxu0 %v2868_v41  ;;  %366 = vmatprep.mubr.f32.mxu0 %v213_v44  ;;  %v2896_v38 = vpack.c.bf16 %v528_v37, %v524_v36  ;;  %v536_v40 = vld [vmem:[%s3762_s2 + $0x60] sm:$0xff] }
  0x2c   : > { %441 = vmatprep.mubr.f32.mxu1 %v215_v45 }
  0x2d   : > { %367 = vmatmul.mubr.f32.gmra.mrb[2].mxu0 %v212_v46  ;;  %2897 = vmatprep.subr.bf16.mxu1 %v2896_v38 }
  0x2e   : > { %2871 = vmatpush3.bf16.msra.mxu0 %v2868_v41  ;;  %442 = vmatmul.mubr.f32.gmra.mrb[2].mxu1 %v214_v48  ;;  %v2900_v41 = vpack.c.bf16 %v536_v40, %v532_v39 }
  0x2f   : > { %2873 = vmatprep.subr.bf16.mxu0 %v2872_v47  ;;  %2653 = vmatprep.mubr.f32.mxu0 %v211_v51 }
  0x30   : > { %2899 = vmatpush3.bf16.msra.mxu1 %v2896_v38 }
  0x31   : > { %2901 = vmatprep.subr.bf16.mxu1 %v2900_v41 }
  0x32   : > { %2875 = vmatpush3.bf16.msra.mxu0 %v2872_v47 }
  0x33   : > { %2877 = vmatprep.subr.bf16.mxu0 %v2876_v52 }
  0x34   : > { %2903 = vmatpush3.bf16.msra.mxu1 %v2900_v41 }
  0x36   : > { %2879 = vmatpush3.bf16.msra.mxu0 %v2876_v52  ;;  %v572_v52 = vlaneseq }
  0x37   : > { %2881 = vmatprep.subr.bf16.mxu0 %v2880_v55 }
  0x38   : > { %v3467_v53 = vshrl.u32 %v572_v52, 7 }
  0x3a   : > { %2883 = vmatpush3.bf16.msra.mxu0 %v2880_v55  ;;  %v3470_v54 = vsub.s32 0, %v3467_v53  ;;  %v540_v55 = vld [vmem:[%s3762_s2 + $0x80] sm:$0xff] }
  0x3b   : > { %2885 = vmatprep.subr.bf16.mxu0 %v2884_v58 }
  0x3c   : > { %v575_v56 = vrot.slane %v540_v55, %v3470_v54 }
  0x3e   : > { %2887 = vmatpush3.bf16.msra.mxu0 %v2884_v58 }
  0x3f   : > { %2889 = vmatprep.subr.bf16.mxu0 %v2888_v61 }
  0x42   : > { %2891 = vmatpush3.bf16.msra.mxu0 %v2888_v61 }
  0x43   : > { %2893 = vmatprep.subr.bf16.mxu0 %v2892_v0 }
  0x46   : > { %2895 = vmatpush3.bf16.msra.mxu0 %v2892_v0 }
  0x49   : > { %2654 = vmatmul.mubr.f32.vlgmr.msra.gmra.mrb[4].mxu0 %v216_v1 }
  0xfc   : > { %v2479_v2 = vpop.f32.mrb[0].mxu0 }
  0xfd   : > { %v2517_v3 = vpop.f32.mrb[0].mxu1  ;;  %v2480_v4 = vpop.f32.mrb[1].mxu0 }
  0xfe   : > { %v2481_v5 = vadd.f32 %v2480_v4, %v2479_v2  ;;  %v2518_v6 = vpop.f32.mrb[1].mxu1  ;;  %v206_v4 = vld [vmem:[%s3763_s3 + $0x10] sm:$0x7] }
  0xff   : > { %v2519_v7 = vadd.f32 %v2518_v6, %v2517_v3  ;;  %v659_v3 = vsub.s32 2, %v3467_v53 }
 0x100   : > { %v2482_v8 = vpop.f32.mrb[2].mxu0 }
 0x101   : > { %v2520_v9 = vpop.f32.mrb[2].mxu1  ;;  %v2483_v10 = vpop.f32.mrb[3].mxu0  ;;  %v439_v11 = vadd.f32 %v2519_v7, %v2481_v5  ;;  %v3500_v5 = vrot.slane %v206_v4, %v659_v3 }
 0x102   : > { %v2484_v12 = vadd.f32 %v2483_v10, %v2482_v8  ;;  %v2521_v13 = vpop.f32.mrb[3].mxu1 }
 0x103   : > { %v2522_v14 = vadd.f32 %v2521_v13, %v2520_v9 }
 0x105   : > { %v444_v15 = vadd.f32 %v2522_v14, %v2484_v12 }
 0x11c   : > { %v2655_v16 = vpop.f32.mrb[4].mxu0 }
 0x11d   : > { %v519_v17 = vadd.f32 %v2655_v16, %v444_v15  ;;  %v513_v19 = vpop.f32.mrb[5].mxu0 }
 0x11e   : > { %v514_v20 = vadd.f32 %v513_v19, %v439_v11 }
 0x11f   : > { %v3443_v23 = vadd.f32 %v519_v17, %v205_v21 }
 0x120   : > { %v3441_v22 = vadd.f32 %v514_v20, %v204_v18 }
 0x121   : > { %v548_v25 = vsel %vm544_vm0, %v3443_v23, 0.0 }
 0x122   : > { %v545_v24 = vsel %vm544_vm0, %v3441_v22, 0.0 }
 0x123   : > { %546 = vadd.xlane.f32.xlu0 %v545_v24 }
 0x127   : > { %549 = vadd.xlane.f32.xlu0 %v548_v25 }
 0x1b0   : > { %v547_v26 = vpop.xlane.xlu0 %546 }
 0x1b1   : > { %v552_v27 = vmul.f32 0.03125, %v547_v26 }
 0x1b3   : > { %v554_v28 = vsub.f32 %v3441_v22, %v552_v27 }
 0x1b4   : > { %v550_v29 = vpop.xlane.xlu0 %549 }
 0x1b5   : > { %v553_v30 = vmul.f32 0.03125, %v550_v29  ;;  %v556_v31 = vmul.f32 %v554_v28, %v554_v28 }
 0x1b7   : > { %v555_v32 = vsub.f32 %v3443_v23, %v553_v30  ;;  %v558_v33 = vsel %vm544_vm0, %v556_v31, 0.0 }
 0x1b8   : > { %559 = vadd.xlane.f32.xlu1 %v558_v33 }
 0x1b9   : > { %v557_v34 = vmul.f32 %v555_v32, %v555_v32 }
 0x1bb   : > { %v561_v35 = vsel %vm544_vm0, %v557_v34, 0.0 }
 0x1bc   : > { %562 = vadd.xlane.f32.xlu1 %v561_v35 }
 0x245   : > { %v560_v42 = vpop.xlane.xlu1 %559 }
 0x246   : > { %v564_v43 = vmul.f32 0.03125, %v560_v42 }
 0x248   : > { %v566_v44 = vadd.f32 1e-06, %v564_v43 }
 0x249   : > { %v563_v45 = vpop.xlane.xlu1 %562 }
 0x24a   : > { %3055 = vrsqrt.f32 %v566_v44  ;;  %v565_v46 = vmul.f32 0.03125, %v563_v45 }
 0x24c   : > { %v567_v47 = vadd.f32 1e-06, %v565_v46 }
 0x24e   : > { %3057 = vrsqrt.f32 %v567_v47 }
 0x254   : > { %v3056_v48 = vpop.eup %3055 }
 0x255   : > { %v570_v49 = vmul.f32 %v3056_v48, %v554_v28 }
 0x257   : > { %2664 = vmatprep.mubr.msk.f32.mxu1 %vm544_vm0, %v570_v49 }
 0x258   : > { %v3058_v50 = vpop.eup %3057 }
 0x259   : > { %v571_v51 = vmul.f32 %v3058_v50, %v555_v32 }
 0x25b   : > { %2665 = vmatmul.mubr.msk.f32.vlgmr.msra.gmra.mrb[4].mxu1 %vm544_vm0, %v571_v51 }
 0x32e   : > { %v2666_v57 = vpop.f32.mrb[4].mxu1 }
 0x32f   : > { %v654_v58 = vadd.f32 %v2666_v57, %v575_v56  ;;  %v648_v59 = vpop.f32.mrb[5].mxu1 }
 0x330   : > { %v649_v60 = vadd.f32 %v648_v59, %v575_v56 }
 0x332   : > { %2671 = vmatprep.mubr.msk.f32.mxu1 %vm667_vm1, %v649_v60  ;;  %v3477_v61 = vpack.i.bf16 %v654_v58, %v649_v60 }
 0x334   : > { %3016 = vrot.lane.b32.xlu0 %v3477_v61, %s3132_s30 }
 0x338   : > { %3026 = vrot.lane.b32.xlu0 %v3477_v61, %s3133_s5 }
 0x33c   : > { %860 = vrot.lane.b32.xlu0 %v649_v60, %s3134_s6 }
 0x340   : > { %862 = vrot.lane.b32.xlu0 %v654_v58, %s3134_s6 }
 0x3a6   : > { %v3017_v62 = vpop.permute.xlu0 %3016 }
 0x3a7   : > { %v3019_v63 = vunpack.i.h.bf16 %v3017_v62  ;;  %v3018_v0 = vunpack.i.l.bf16 %v3017_v62 }
 0x3a9   : > { %v2904_v2 = vpack.c.bf16 %v3019_v63, %v3018_v0 }
 0x3aa   : > { %v3027_v26 = vpop.permute.xlu0 %3026 }
 0x3ab   : > { %2906 = vmatprep.subr.msk.bf16.mxu1 %vm3487_vm2, %v2904_v2  ;;  %v3029_v28 = vunpack.i.h.bf16 %v3027_v26  ;;  %v3028_v29 = vunpack.i.l.bf16 %v3027_v26 }
 0x3ac   : > { %2909 = vmatpush3.bf16.xpose.msk.msra.mxu1 %vm3487_vm2, %v2904_v2 }
 0x3ad   : > { %v2914_v33 = vpack.c.bf16 %v3029_v28, %v3028_v29 }
 0x3ae   : > { %v861_v38 = vpop.permute.xlu0 %860 }
 0x3b2   : > { %v863_v39 = vpop.permute.xlu0 %862 }
 0x3b3   : > { %2672 = vmatmul.mubr.msk.f32.vlgmr.msra.gmra.mrb[6].mxu1 %vm667_vm1, %v654_v58 }
 0x486   : > { %v2673_v6 = vpop.f32.mrb[6].mxu1 }
 0x487   : > { %v742_v7 = vpop.f32.mrb[7].mxu1  ;;  %v748_v9 = vadd.f32 %v2673_v6, %v3500_v5 }
 0x488   : > { %v743_v8 = vadd.f32 %v742_v7, %v3500_v5 }
 0x489   : > { %v754_v11 = vsel %vm667_vm1, %v748_v9, -inf }
 0x48a   : > { %v751_v10 = vsel %vm667_vm1, %v743_v8, -inf }
 0x48b   : > { %752 = vmax.xlane.f32.xlu1 %v751_v10  ;;  %v533_v10 = vld [vmem:[%s3762_s2 + $0x48] sm:$0xff] }
 0x48f   : > { %755 = vmax.xlane.f32.xlu1 %v754_v11 }
 0x518   : > { %v753_v12 = vpop.xlane.xlu1 %752 }
 0x519   : > { %v757_v13 = vsub.f32 %v743_v8, %v753_v12  ;;  %v525_v8 = vld [vmem:[%s3762_s2 + $0x8] sm:$0xff] }
 0x51a   : > { %v537_v12 = vld [vmem:[%s3762_s2 + $0x68] sm:$0xff] }
 0x51b   : > { %v759_v16 = vmul.f32 1.442695, %v757_v13  ;;  %v2928_v13 = vpack.c.bf16 %v537_v12, %v533_v10 }
 0x51c   : > { %v756_v14 = vpop.xlane.xlu1 %755 }
 0x51d   : > { %v758_v15 = vsub.f32 %v748_v9, %v756_v14  ;;  %v529_v9 = vld [vmem:[%s3762_s2 + $0x28] sm:$0xff] }
 0x51e   : > { %v2924_v11 = vpack.c.bf16 %v529_v9, %v525_v8 }
 0x51f   : > { %v761_v17 = vmul.f32 1.442695, %v758_v15 }
 0x521   : > { %3059 = vpow2.f32 %v761_v17 }
 0x522   : > { %3061 = vpow2.f32 %v759_v16 }
 0x52b   : > { %v3060_v18 = vpop.eup %3059 }
 0x52c   : > { %v766_v19 = vsel %vm667_vm1, %v3060_v18, 0.0  ;;  %v3062_v20 = vpop.eup %3061 }
 0x52d   : > { %767 = vadd.xlane.f32.xlu1 %v766_v19  ;;  %v763_v21 = vsel %vm667_vm1, %v3062_v20, 0.0 }
 0x531   : > { %764 = vadd.xlane.f32.xlu1 %v763_v21 }
 0x542   : > { %3021 = vrot.lane.b32.xlu1 %v3477_v61, %s3135_s8 }
 0x5ba   : > { %v768_v24 = vpop.xlane.xlu1 %767 }
 0x5bb   : > { %3063 = vrcp.f32 %v768_v24 }
 0x5be   : > { %v765_v25 = vpop.xlane.xlu1 %764 }
 0x5bf   : > { %3065 = vrcp.f32 %v765_v25 }
 0x5c2   : > { %v3022_v27 = vpop.permute.xlu1 %3021 }
 0x5c3   : > { %v3024_v30 = vunpack.i.h.bf16 %v3022_v27  ;;  %v3023_v31 = vunpack.i.l.bf16 %v3022_v27 }
 0x5c5   : > { %v2910_v32 = vpack.c.bf16 %v3024_v30, %v3023_v31  ;;  %v3064_v34 = vpop.eup %3063 }
 0x5c6   : > { %v772_v37 = vmul.f32 %v3064_v34, %v3060_v18 }
 0x5c7   : > { %2911 = vmatprep.subr.bf16.mxu1 %v2910_v32 }
 0x5c8   : > { %2913 = vmatpush3.bf16.msra.mxu1 %v2910_v32 }
 0x5c9   : > { %v3066_v35 = vpop.eup %3065  ;;  %2916 = vmatprep.subr.msk.bf16.mxu1 %vm3487_vm2, %v2914_v33 }
 0x5ca   : > { %v770_v36 = vmul.f32 %v3066_v35, %v3062_v20  ;;  %v541_v20 = vld [vmem:[%s3762_s2 + $0x88] sm:$0xff] }
 0x5cb   : > { %v1156_v21 = vrot.slane %v541_v20, %v3470_v54 }
 0x5cc   : > { %2678 = vmatprep.mubr.msk.f32.mxu1 %vm667_vm1, %v770_v36 }
 0x5cd   : > { %2679 = vmatmul.mubr.msk.f32.vlgmr.msra.gmra.mrb[8].mxu1 %vm667_vm1, %v772_v37 }
 0x5ce   : > { %2685 = vmatprep.mubr.msk.f32.mxu1 %vm667_vm1, %v861_v38 }
 0x5d1   : > { %2919 = vmatpush3.bf16.xpose.msk.msra.mxu1 %vm3487_vm2, %v2914_v33 }
 0x5d8   : > { %2686 = vmatmul.mubr.msk.f32.vlgmr.msra.gmra.mrb[10].mxu1 %vm667_vm1, %v863_v39 }
 0x6a0   : > { %v2680_v40 = vpop.f32.mrb[8].mxu1 }
 0x6a1   : > { %v851_v41 = vpop.f32.mrb[9].mxu1 }
 0x6ab   : > { %v2687_v42 = vpop.f32.mrb[10].mxu1 }
 0x6ac   : > { %v948_v43 = vadd.f32 %v2687_v42, %v3500_v5  ;;  %v942_v44 = vpop.f32.mrb[11].mxu1  ;;  %v534_v42 = vld [vmem:[%s3762_s2 + $0x50] sm:$0xff] }
 0x6ad   : > { %v943_v45 = vadd.f32 %v942_v44, %v3500_v5  ;;  %v538_v44 = vld [vmem:[%s3762_s2 + $0x70] sm:$0xff] }
 0x6ae   : > { %v954_v46 = vsel %vm667_vm1, %v948_v43, -inf }
 0x6af   : > { %955 = vmax.xlane.f32.xlu0 %v954_v46  ;;  %v951_v47 = vsel %vm667_vm1, %v943_v45, -inf }
 0x6b0   : > { %952 = vmax.xlane.f32.xlu1 %v951_v47 }
 0x6c1   : > { %3031 = vrot.lane.b32.xlu1 %v3477_v61, %s3136_s9 }
 0x73c   : > { %v956_v48 = vpop.xlane.xlu0 %955 }
 0x73d   : > { %v958_v49 = vsub.f32 %v948_v43, %v956_v48  ;;  %v953_v50 = vpop.xlane.xlu1 %952 }
 0x73e   : > { %v957_v51 = vsub.f32 %v943_v45, %v953_v50  ;;  %v2936_v45 = vpack.c.bf16 %v538_v44, %v534_v42 }
 0x73f   : > { %v961_v52 = vmul.f32 1.442695, %v958_v49 }
 0x740   : > { %v959_v55 = vmul.f32 1.442695, %v957_v51 }
 0x741   : > { %v3032_v56 = vpop.permute.xlu1 %3031 }
 0x742   : > { %3067 = vpow2.f32 %v959_v55  ;;  %v3034_v57 = vunpack.i.h.bf16 %v3032_v56  ;;  %v3033_v58 = vunpack.i.l.bf16 %v3032_v56 }
 0x743   : > { %3069 = vpow2.f32 %v961_v52 }
 0x744   : > { %v2920_v59 = vpack.c.bf16 %v3034_v57, %v3033_v58  ;;  %v527_v58 = vld [vmem:[%s3762_s2 + $0x18] sm:$0xff] }
 0x746   : > { %2921 = vmatprep.subr.bf16.mxu1 %v2920_v59 }
 0x747   : > { %2923 = vmatpush3.bf16.msra.mxu1 %v2920_v59  ;;  %v531_v59 = vld [vmem:[%s3762_s2 + $0x38] sm:$0xff] }
 0x748   : > { %2925 = vmatprep.subr.bf16.mxu1 %v2924_v11 }
 0x74c   : > { %v3068_v60 = vpop.eup %3067 }
 0x74d   : > { %v963_v62 = vsel %vm667_vm1, %v3068_v60, 0.0  ;;  %v3070_v63 = vpop.eup %3069 }
 0x74e   : > { %964 = vadd.xlane.f32.xlu0 %v963_v62  ;;  %v966_v61 = vsel %vm667_vm1, %v3070_v63, 0.0  ;;  %v535_v62 = vld [vmem:[%s3762_s2 + $0x58] sm:$0xff] }
 0x752   : > { %967 = vadd.xlane.f32.xlu0 %v966_v61 }
 0x7db   : > { %v965_v0 = vpop.xlane.xlu0 %964 }
 0x7dc   : > { %3071 = vrcp.f32 %v965_v0  ;;  %v542_v0 = vld [vmem:[%s3762_s2 + $0x90] sm:$0xff] }
 0x7df   : > { %v968_v2 = vpop.xlane.xlu0 %967 }
 0x7e0   : > { %3073 = vrcp.f32 %v968_v2  ;;  %v1188_v2 = vrot.slane %v542_v0, %v3470_v54 }
 0x7e6   : > { %v3072_v3 = vpop.eup %3071 }
 0x7e7   : > { %v970_v4 = vmul.f32 %v3072_v3, %v3068_v60  ;;  %v2940_v60 = vpack.c.bf16 %v531_v59, %v527_v58 }
 0x7e9   : > { %2692 = vmatprep.mubr.msk.f32.mxu1 %vm667_vm1, %v970_v4  ;;  %2941 = vmatprep.subr.bf16.mxu0 %v2940_v60 }
 0x7ea   : > { %v3074_v6 = vpop.eup %3073  ;;  %2943 = vmatpush3.bf16.xpose.msra.mxu0 %v2940_v60 }
 0x7eb   : > { %v972_v7 = vmul.f32 %v3074_v6, %v3070_v63  ;;  %v539_v63 = vld [vmem:[%s3762_s2 + $0x78] sm:$0xff] }
 0x7ec   : > { %v2944_v61 = vpack.c.bf16 %v539_v63, %v535_v62  ;;  %v543_v63 = vld [vmem:[%s3762_s2 + $0x98] sm:$0xff] }
 0x7ed   : > { %2693 = vmatmul.mubr.msk.f32.vlgmr.msra.gmra.mrb[12].mxu1 %vm667_vm1, %v972_v7 }
 0x7ee   : > { %2927 = vmatpush3.bf16.msra.mxu1 %v2924_v11  ;;  %2945 = vmatprep.subr.bf16.mxu0 %v2944_v61 }
 0x7ef   : > { %2929 = vmatprep.subr.bf16.mxu1 %v2928_v13 }
 0x7f2   : > { %2931 = vmatpush3.bf16.msra.mxu1 %v2928_v13  ;;  %2947 = vmatpush3.bf16.xpose.msra.mxu0 %v2944_v61  ;;  %v1404_v61 = vrot.slane %v543_v63, %v3470_v54 }
 0x8c0   : > { %v2694_v14 = vpop.f32.mrb[12].mxu1 }
 0x8c1   : > { %1064 = vrot.lane.b32.xlu1 %v2694_v14, %s3137_s20  ;;  %v1051_v15 = vpop.f32.mrb[13].mxu1 }
 0x8c2   : > { %1062 = vrot.lane.b32.xlu0 %v1051_v15, %s3137_s20 }
 0x933   : > { %v1065_v16 = vpop.permute.xlu1 %1064 }
 0x934   : > { %v1063_v17 = vpop.permute.xlu0 %1062  ;;  %v1069_v19 = vsel %vm667_vm1, %v2680_v40, %v1065_v16  ;;  %v526_v40 = vld [vmem:[%s3762_s2 + $0x10] sm:$0xff] }
 0x935   : > { %v1068_v18 = vsel %vm667_vm1, %v851_v41, %v1063_v17  ;;  %v530_v41 = vld [vmem:[%s3762_s2 + $0x30] sm:$0xff] }
 0x936   : > { %2703 = vmatprep.mubr.msk.f32.mxu1 %vm544_vm0, %v1068_v18  ;;  %v2932_v43 = vpack.c.bf16 %v530_v41, %v526_v40 }
 0x937   : > { %2704 = vmatmul.mubr.msk.f32.vlgmr.msra.gmra.mrb[14].mxu1 %vm544_vm0, %v1069_v19 }
 0x938   : > { %2933 = vmatprep.subr.bf16.mxu1 %v2932_v43 }
 0x939   : > { %2935 = vmatpush3.bf16.msra.mxu1 %v2932_v43 }
 0x93a   : > { %2937 = vmatprep.subr.bf16.mxu1 %v2936_v45 }
 0x93d   : > { %2939 = vmatpush3.bf16.msra.mxu1 %v2936_v45 }
 0xa0a   : > { %v2705_v24 = vpop.f32.mrb[14].mxu1 }
 0xa0b   : > { %v1152_v25 = vadd.f32 %v2705_v24, %v3443_v23  ;;  %v1142_v26 = vpop.f32.mrb[15].mxu1 }
 0xa0c   : > { %v1151_v27 = vadd.f32 %v1142_v26, %v3441_v22 }
 0xa0d   : > { %v3552_v28 = vadd.f32 %v1156_v21, %v1152_v25 }
 0xa0e   : > { %v3554_v29 = vadd.f32 %v1156_v21, %v1151_v27 }
 0xa0f   : > { %v1162_v30 = vsel %vm544_vm0, %v3552_v28, 0.0 }
 0xa10   : > { %1163 = vadd.xlane.f32.xlu0 %v1162_v30  ;;  %v1159_v31 = vsel %vm544_vm0, %v3554_v29, 0.0 }
 0xa11   : > { %1160 = vadd.xlane.f32.xlu1 %v1159_v31 }
 0xa9d   : > { %v1164_v32 = vpop.xlane.xlu0 %1163 }
 0xa9e   : > { %v1166_v33 = vmul.f32 0.03125, %v1164_v32  ;;  %v1161_v34 = vpop.xlane.xlu1 %1160 }
 0xa9f   : > { %v1165_v35 = vmul.f32 0.03125, %v1161_v34 }
 0xaa0   : > { %v1168_v23 = vsub.f32 %v3552_v28, %v1166_v33 }
 0xaa1   : > { %v1167_v22 = vsub.f32 %v3554_v29, %v1165_v35 }
 0xaa2   : > { %v1170_v36 = vmul.f32 %v1168_v23, %v1168_v23 }
 0xaa3   : > { %v1169_v37 = vmul.f32 %v1167_v22, %v1167_v22 }
 0xaa4   : > { %v1174_v38 = vsel %vm544_vm0, %v1170_v36, 0.0 }
 0xaa5   : > { %1175 = vadd.xlane.f32.xlu1 %v1174_v38  ;;  %v1171_v39 = vsel %vm544_vm0, %v1169_v37, 0.0 }
 0xaa6   : > { %1172 = vadd.xlane.f32.xlu0 %v1171_v39 }
 0xb32   : > { %v1176_v46 = vpop.xlane.xlu1 %1175 }
 0xb33   : > { %v1178_v47 = vmul.f32 0.03125, %v1176_v46  ;;  %v1173_v48 = vpop.xlane.xlu0 %1172 }
 0xb34   : > { %v1177_v49 = vmul.f32 0.03125, %v1173_v48 }
 0xb35   : > { %v1180_v50 = vadd.f32 1e-06, %v1178_v47 }
 0xb36   : > { %v1179_v51 = vadd.f32 1e-06, %v1177_v49 }
 0xb37   : > { %3075 = vrsqrt.f32 %v1180_v50 }
 0xb38   : > { %3077 = vrsqrt.f32 %v1179_v51 }
 0xb41   : > { %v3076_v52 = vpop.eup %3075 }
 0xb42   : > { %v3078_v55 = vpop.eup %3077  ;;  %v1184_v57 = vmul.f32 %v3076_v52, %v1168_v23 }
 0xb43   : > { %v1183_v56 = vmul.f32 %v3078_v55, %v1167_v22 }
 0xb45   : > { %2714 = vmatprep.mubr.msk.f32.mxu1 %vm544_vm0, %v1183_v56 }
 0xb46   : > { %2715 = vmatmul.mubr.msk.f32.vlgmr.msra.gmra.mrb[16].mxu1 %vm544_vm0, %v1184_v57 }
 0xc19   : > { %v2716_v3 = vpop.f32.mrb[16].mxu1 }
 0xc1a   : > { %v1267_v4 = vadd.f32 %v2716_v3, %v1188_v2  ;;  %v1261_v6 = vpop.f32.mrb[17].mxu1 }
 0xc1b   : > { %v1262_v7 = vadd.f32 %v1261_v6, %v1188_v2 }
 0xc1c   : > { %v1273_v8 = vmul.f32 0.70710677, %v1267_v4  ;;  %v1271_v59 = vmul.f32 0.5, %v1267_v4 }
 0xc1d   : > { %v1272_v9 = vmul.f32 0.70710677, %v1262_v7  ;;  %v1270_v57 = vmul.f32 0.5, %v1262_v7 }
 0xc1e   : > { %v1275_v10 = vand.u32 2147483647, %v1273_v8  ;;  %vm1315_vm3 = vcmp.lt.f32.partialorder %v1273_v8, 0.0 }
 0xc1f   : > { %v1274_v11 = vand.u32 2147483647, %v1272_v9  ;;  %vm1314_vm4 = vcmp.lt.f32.partialorder %v1272_v9, 0.0 }
 0xc20   : > { %v1277_v12 = vmul.f32 0.3275911, %v1275_v10  ;;  %v1303_v16 = vsub.f32 0.0, %v1275_v10 }
 0xc21   : > { %v1276_v13 = vmul.f32 0.3275911, %v1274_v11  ;;  %v1302_v17 = vsub.f32 0.0, %v1274_v11 }
 0xc22   : > { %v1279_v14 = vadd.f32 1.0, %v1277_v12  ;;  %v1305_v19 = vmul.f32 %v1303_v16, %v1275_v10 }
 0xc23   : > { %v1278_v15 = vadd.f32 1.0, %v1276_v13  ;;  %v1304_v24 = vmul.f32 %v1302_v17, %v1274_v11 }
 0xc24   : > { %3079 = vrcp.f32 %v1279_v14  ;;  %v1308_v27 = vmul.f32 1.442695, %v1305_v19  ;;  %v2411_v19 = vld [vmem:[%s3762_s2 + $0xc0] sm:$0xff] }
 0xc25   : > { %3081 = vrcp.f32 %v1278_v15  ;;  %v1306_v32 = vmul.f32 1.442695, %v1304_v24  ;;  %v2419_v24 = vld [vmem:[%s3762_s2 + $0x100] sm:$0xff] }
 0xc26   : > { %3083 = vpow2.f32 %v1308_v27 }
 0xc27   : > { %3085 = vpow2.f32 %v1306_v32 }
 0xc2e   : > { %v3080_v18 = vpop.eup %3079 }
 0xc2f   : > { %v3082_v20 = vpop.eup %3081  ;;  %v1285_v21 = vmul.f32 1.0614054, %v3080_v18 }
 0xc30   : > { %v1284_v25 = vmul.f32 1.0614054, %v3082_v20  ;;  %v3084_v43 = vpop.eup %3083 }
 0xc31   : > { %v1287_v26 = vadd.f32 -1.4531521, %v1285_v21  ;;  %v3086_v45 = vpop.eup %3085 }
 0xc32   : > { %v1286_v30 = vadd.f32 -1.4531521, %v1284_v25 }
 0xc33   : > { %v1289_v31 = vmul.f32 %v3080_v18, %v1287_v26 }
 0xc34   : > { %v1288_v33 = vmul.f32 %v3082_v20, %v1286_v30 }
 0xc35   : > { %v1291_v34 = vadd.f32 1.4214138, %v1289_v31 }
 0xc36   : > { %v1290_v35 = vadd.f32 1.4214138, %v1288_v33 }
 0xc37   : > { %v1293_v23 = vmul.f32 %v3080_v18, %v1291_v34 }
 0xc38   : > { %v1292_v22 = vmul.f32 %v3082_v20, %v1290_v35 }
 0xc39   : > { %v1295_v36 = vadd.f32 -0.28449672, %v1293_v23 }
 0xc3a   : > { %v1294_v37 = vadd.f32 -0.28449672, %v1292_v22 }
 0xc3b   : > { %v1297_v38 = vmul.f32 %v3080_v18, %v1295_v36  ;;  %v2423_v36 = vld [vmem:[%s3762_s2 + $0x120] sm:$0xff] }
 0xc3c   : > { %v1296_v39 = vmul.f32 %v3082_v20, %v1294_v37  ;;  %v1457_v37 = vrot.slane %v2423_v36, %v3470_v54 }
 0xc3d   : > { %v1299_v40 = vadd.f32 0.2548296, %v1297_v38 }
 0xc3e   : > { %v1298_v41 = vadd.f32 0.2548296, %v1296_v39 }
 0xc3f   : > { %v1301_v42 = vmul.f32 %v3080_v18, %v1299_v40  ;;  %v2407_v18 = vld [vmem:[%s3762_s2 + $0xa0] sm:$0xff] }
 0xc40   : > { %v1300_v44 = vmul.f32 %v3082_v20, %v1298_v41  ;;  %v2415_v20 = vld [vmem:[%s3762_s2 + $0xe0] sm:$0xff]  ;;  %v2948_v21 = vpack.c.bf16 %v2411_v19, %v2407_v18 }
 0xc41   : > { %v1311_v46 = vmul.f32 %v3084_v43, %v1301_v42  ;;  %v2952_v25 = vpack.c.bf16 %v2419_v24, %v2415_v20 }
 0xc42   : > { %v1310_v47 = vmul.f32 %v3086_v45, %v1300_v44  ;;  %2949 = vmatprep.subr.bf16.mxu1 %v2948_v21 }
 0xc43   : > { %v1313_v48 = vsub.f32 1.0, %v1311_v46  ;;  %2951 = vmatpush3.bf16.msra.mxu1 %v2948_v21 }
 0xc44   : > { %v1312_v49 = vsub.f32 1.0, %v1310_v47  ;;  %2953 = vmatprep.subr.bf16.mxu1 %v2952_v25 }
 0xc45   : > { %v1317_v50 = vsub.f32 0.0, %v1313_v48 }
 0xc46   : > { %v1316_v51 = vsub.f32 0.0, %v1312_v49 }
 0xc47   : > { %v1319_v52 = vsel %vm1315_vm3, %v1317_v50, %v1313_v48  ;;  %2955 = vmatpush3.bf16.msra.mxu1 %v2952_v25 }
 0xc48   : > { %v1321_v55 = vadd.f32 1.0, %v1319_v52  ;;  %v1318_v56 = vsel %vm1314_vm4, %v1316_v51, %v1312_v49 }
 0xc49   : > { %v1320_v58 = vadd.f32 1.0, %v1318_v56 }
 0xc4a   : > { %v1323_v62 = vmul.f32 %v1321_v55, %v1271_v59 }
 0xc4b   : > { %v1322_v60 = vmul.f32 %v1320_v58, %v1270_v57 }
 0xc4d   : > { %2725 = vmatprep.mubr.f32.mxu0 %v1322_v60 }
 0xc4e   : > { %2726 = vmatmul.mubr.f32.vlgmr.msra.gmra.mrb[6].mxu0 %v1323_v62 }
 0xd21   : > { %v2727_v0 = vpop.f32.mrb[6].mxu0 }
 0xd22   : > { %v1400_v2 = vadd.f32 %v2727_v0, %v3552_v28  ;;  %v1390_v3 = vpop.f32.mrb[7].mxu0 }
 0xd23   : > { %v1399_v6 = vadd.f32 %v1390_v3, %v3554_v29 }
 0xd24   : > { %v3600_v8 = vadd.f32 %v1404_v61, %v1400_v2 }
 0xd25   : > { %v3602_v7 = vadd.f32 %v1404_v61, %v1399_v6 }
 0xd26   : > { %v1431_v4 = vsel %vm544_vm0, %v3600_v8, 0.0 }
 0xd27   : > { %1432 = vadd.xlane.f32.xlu1 %v1431_v4  ;;  %v1428_v9 = vsel %vm544_vm0, %v3602_v7, 0.0 }
 0xd28   : > { %1429 = vadd.xlane.f32.xlu0 %v1428_v9 }
 0xdb4   : > { %v1433_v10 = vpop.xlane.xlu1 %1432 }
 0xdb5   : > { %v1435_v11 = vmul.f32 0.03125, %v1433_v10  ;;  %v1430_v12 = vpop.xlane.xlu0 %1429 }
 0xdb6   : > { %v1434_v13 = vmul.f32 0.03125, %v1430_v12 }
 0xdb7   : > { %v1437_v28 = vsub.f32 %v3600_v8, %v1435_v11 }
 0xdb8   : > { %v1436_v29 = vsub.f32 %v3602_v7, %v1434_v13 }
 0xdb9   : > { %v1439_v14 = vmul.f32 %v1437_v28, %v1437_v28 }
 0xdba   : > { %v1438_v15 = vmul.f32 %v1436_v29, %v1436_v29 }
 0xdbb   : > { %v1443_v16 = vsel %vm544_vm0, %v1439_v14, 0.0 }
 0xdbc   : > { %1444 = vadd.xlane.f32.xlu1 %v1443_v16  ;;  %v1440_v17 = vsel %vm544_vm0, %v1438_v15, 0.0 }
 0xdbd   : > { %1441 = vadd.xlane.f32.xlu0 %v1440_v17 }
 0xe49   : > { %v1445_v26 = vpop.xlane.xlu1 %1444 }
 0xe4a   : > { %v1447_v27 = vmul.f32 0.03125, %v1445_v26  ;;  %v1442_v30 = vpop.xlane.xlu0 %1441 }
 0xe4b   : > { %v1446_v31 = vmul.f32 0.03125, %v1442_v30 }
 0xe4c   : > { %v1449_v32 = vadd.f32 1e-06, %v1447_v27 }
 0xe4d   : > { %v1448_v33 = vadd.f32 1e-06, %v1446_v31 }
 0xe4e   : > { %3087 = vrsqrt.f32 %v1449_v32 }
 0xe4f   : > { %3089 = vrsqrt.f32 %v1448_v33 }
 0xe58   : > { %v3088_v34 = vpop.eup %3087 }
 0xe59   : > { %v3090_v35 = vpop.eup %3089  ;;  %v1453_v22 = vmul.f32 %v3088_v34, %v1437_v28 }
 0xe5a   : > { %v1452_v23 = vmul.f32 %v3090_v35, %v1436_v29 }
 0xe5c   : > { %2736 = vmatprep.mubr.msk.f32.mxu1 %vm544_vm0, %v1452_v23 }
 0xe5d   : > { %2737 = vmatmul.mubr.msk.f32.vlgmr.msra.gmra.mrb[18].mxu1 %vm544_vm0, %v1453_v22 }
 0xf30   : > { %v2738_v38 = vpop.f32.mrb[18].mxu1 }
 0xf31   : > { %v1536_v39 = vadd.f32 %v2738_v38, %v1457_v37  ;;  %v1530_v40 = vpop.f32.mrb[19].mxu1 }
 0xf32   : > { %v1531_v41 = vadd.f32 %v1530_v40, %v1457_v37 }
 0xf34   : > { %2743 = vmatprep.mubr.msk.f32.mxu1 %vm667_vm1, %v1531_v41  ;;  %v3631_v42 = vpack.i.bf16 %v1536_v39, %v1531_v41 }
 0xf36   : > { %3041 = vrot.lane.b32.xlu1 %v3631_v42, %s3133_s5  ;;  %3036 = vrot.lane.b32.xlu0 %v3631_v42, %s3132_s30 }
 0xf3a   : > { %1737 = vrot.lane.b32.xlu1 %v1531_v41, %s3134_s6 }
 0xf3e   : > { %1739 = vrot.lane.b32.xlu1 %v1536_v39, %s3134_s6 }
 0xfa8   : > { %v3042_v43 = vpop.permute.xlu1 %3041  ;;  %v3037_v44 = vpop.permute.xlu0 %3036 }
 0xfa9   : > { %v3044_v45 = vunpack.i.h.bf16 %v3042_v43  ;;  %v3043_v46 = vunpack.i.l.bf16 %v3042_v43  ;;  %v3039_v47 = vunpack.i.h.bf16 %v3037_v44  ;;  %v3038_v48 = vunpack.i.l.bf16 %v3037_v44 }
 0xfab   : > { %v2956_v49 = vpack.c.bf16 %v3039_v47, %v3038_v48  ;;  %v2966_v50 = vpack.c.bf16 %v3044_v45, %v3043_v46  ;;  %v2408_v45 = vld [vmem:[%s3762_s2 + $0xa8] sm:$0xff] }
 0xfac   : > { %v1738_v51 = vpop.permute.xlu1 %1737  ;;  %v2412_v46 = vld [vmem:[%s3762_s2 + $0xc8] sm:$0xff] }
 0xfad   : > { %2958 = vmatprep.subr.msk.bf16.mxu1 %vm3487_vm2, %v2956_v49  ;;  %v2976_v47 = vpack.c.bf16 %v2412_v46, %v2408_v45  ;;  %v2416_v48 = vld [vmem:[%s3762_s2 + $0xe8] sm:$0xff] }
 0xfae   : > { %2961 = vmatpush3.bf16.xpose.msk.msra.mxu1 %vm3487_vm2, %v2956_v49  ;;  %v2420_v49 = vld [vmem:[%s3762_s2 + $0x108] sm:$0xff] }
 0xfaf   : > { %2968 = vmatprep.subr.msk.bf16.mxu1 %vm3487_vm2, %v2966_v50 }
 0xfb0   : > { %v1740_v52 = vpop.permute.xlu1 %1739 }
 0xfb5   : > { %2744 = vmatmul.mubr.msk.f32.vlgmr.msra.gmra.mrb[20].mxu1 %vm667_vm1, %v1536_v39 }
 0xfb6   : > { %2971 = vmatpush3.bf16.xpose.msk.msra.mxu1 %vm3487_vm2, %v2966_v50  ;;  %2757 = vmatprep.mubr.msk.f32.mxu1 %vm667_vm1, %v1738_v51  ;;  %v2980_v50 = vpack.c.bf16 %v2420_v49, %v2416_v48 }
 0xfbd   : > { %2758 = vmatmul.mubr.msk.f32.vlgmr.msra.gmra.mrb[22].mxu1 %vm667_vm1, %v1740_v52 }
0x1088   : > { %v2745_v55 = vpop.f32.mrb[20].mxu1 }
0x1089   : > { %v1625_v56 = vadd.f32 %v2745_v55, %v3500_v5  ;;  %v1619_v57 = vpop.f32.mrb[21].mxu1 }
0x108a   : > { %v1620_v58 = vadd.f32 %v1619_v57, %v3500_v5 }
0x108b   : > { %v1631_v59 = vsel %vm667_vm1, %v1625_v56, -inf }
0x108c   : > { %1632 = vmax.xlane.f32.xlu1 %v1631_v59  ;;  %v1628_v60 = vsel %vm667_vm1, %v1620_v58, -inf }
0x108d   : > { %1629 = vmax.xlane.f32.xlu0 %v1628_v60 }
0x1090   : > { %v2759_v62 = vpop.f32.mrb[22].mxu1 }
0x1091   : > { %v1819_v1 = vpop.f32.mrb[23].mxu1  ;;  %v1825_v61 = vadd.f32 %v2759_v62, %v3500_v5  ;;  %v2424_v62 = vld [vmem:[%s3762_s2 + $0x128] sm:$0xff] }
0x1092   : > { %v1820_v63 = vadd.f32 %v1819_v1, %v3500_v5  ;;  %v2033_v1 = vrot.slane %v2424_v62, %v3470_v54 }
0x1093   : > { %v1831_v2 = vsel %vm667_vm1, %v1825_v61, -inf }
0x1094   : > { %v1828_v0 = vsel %vm667_vm1, %v1820_v63, -inf }
0x1095   : > { %1829 = vmax.xlane.f32.xlu0 %v1828_v0 }
0x1099   : > { %1832 = vmax.xlane.f32.xlu0 %v1831_v2 }
0x1119   : > { %v1633_v3 = vpop.xlane.xlu1 %1632 }
0x111a   : > { %v1635_v6 = vsub.f32 %v1625_v56, %v1633_v3  ;;  %v1630_v4 = vpop.xlane.xlu0 %1629 }
0x111b   : > { %v1634_v9 = vsub.f32 %v1620_v58, %v1630_v4 }
0x111c   : > { %v1638_v10 = vmul.f32 1.442695, %v1635_v6 }
0x111d   : > { %v1636_v11 = vmul.f32 1.442695, %v1634_v9 }
0x111e   : > { %3091 = vpow2.f32 %v1638_v10 }
0x111f   : > { %3093 = vpow2.f32 %v1636_v11 }
0x1122   : > { %v1830_v12 = vpop.xlane.xlu0 %1829 }
0x1123   : > { %v1834_v13 = vsub.f32 %v1820_v63, %v1830_v12 }
0x1125   : > { %v1836_v28 = vmul.f32 1.442695, %v1834_v13 }
0x1126   : > { %v1833_v29 = vpop.xlane.xlu0 %1832 }
0x1127   : > { %3095 = vpow2.f32 %v1836_v28  ;;  %v1835_v5 = vsub.f32 %v1825_v61, %v1833_v29 }
0x1128   : > { %v3092_v14 = vpop.eup %3091 }
0x1129   : > { %v3094_v15 = vpop.eup %3093  ;;  %v1838_v16 = vmul.f32 1.442695, %v1835_v5  ;;  %v1643_v17 = vsel %vm667_vm1, %v3092_v14, 0.0 }
0x112a   : > { %1644 = vadd.xlane.f32.xlu1 %v1643_v17  ;;  %v1640_v18 = vsel %vm667_vm1, %v3094_v15, 0.0  ;;  %v2417_v17 = vld [vmem:[%s3762_s2 + $0xf0] sm:$0xff] }
0x112b   : > { %3097 = vpow2.f32 %v1838_v16  ;;  %1641 = vadd.xlane.f32.xlu0 %v1640_v18  ;;  %v2413_v16 = vld [vmem:[%s3762_s2 + $0xd0] sm:$0xff] }
0x1131   : > { %v3096_v19 = vpop.eup %3095 }
0x1132   : > { %v1840_v20 = vsel %vm667_vm1, %v3096_v19, 0.0 }
0x1133   : > { %1841 = vadd.xlane.f32.xlu0 %v1840_v20 }
0x1135   : > { %v3098_v21 = vpop.eup %3097 }
0x1136   : > { %v1843_v24 = vsel %vm667_vm1, %v3098_v21, 0.0 }
0x1137   : > { %1844 = vadd.xlane.f32.xlu1 %v1843_v24 }
0x1148   : > { %3051 = vrot.lane.b32.xlu1 %v3631_v42, %s3136_s9 }
0x1149   : > { %3046 = vrot.lane.b32.xlu0 %v3631_v42, %s3135_s8 }
0x11b7   : > { %v1645_v26 = vpop.xlane.xlu1 %1644 }
0x11b8   : > { %v1642_v25 = vpop.xlane.xlu0 %1641 }
0x11b9   : > { %3099 = vrcp.f32 %v1642_v25 }
0x11ba   : > { %3101 = vrcp.f32 %v1645_v26 }
0x11c0   : > { %v1842_v27 = vpop.xlane.xlu0 %1841 }
0x11c1   : > { %3103 = vrcp.f32 %v1842_v27 }
0x11c3   : > { %v3100_v30 = vpop.eup %3099 }
0x11c4   : > { %v1845_v31 = vpop.xlane.xlu1 %1844  ;;  %v3047_v32 = vpop.permute.xlu0 %3046  ;;  %v1647_v33 = vmul.f32 %v3100_v30, %v3094_v15  ;;  %v2409_v15 = vld [vmem:[%s3762_s2 + $0xb0] sm:$0xff] }
0x11c5   : > { %3105 = vrcp.f32 %v1845_v31  ;;  %v3049_v34 = vunpack.i.h.bf16 %v3047_v32  ;;  %v3048_v35 = vunpack.i.l.bf16 %v3047_v32  ;;  %v3102_v22 = vpop.eup %3101  ;;  %v2984_v18 = vpack.c.bf16 %v2413_v16, %v2409_v15 }
0x11c6   : > { %2750 = vmatprep.mubr.msk.f32.mxu0 %vm667_vm1, %v1647_v33  ;;  %v1649_v40 = vmul.f32 %v3102_v22, %v3092_v14 }
0x11c7   : > { %v2962_v23 = vpack.c.bf16 %v3049_v34, %v3048_v35  ;;  %2985 = vmatprep.subr.bf16.mxu1 %v2984_v18  ;;  %v2410_v35 = vld [vmem:[%s3762_s2 + $0xb8] sm:$0xff] }
0x11c8   : > { %v3052_v36 = vpop.permute.xlu1 %3051  ;;  %2987 = vmatpush3.bf16.msra.mxu1 %v2984_v18 }
0x11c9   : > { %v3054_v37 = vunpack.i.h.bf16 %v3052_v36  ;;  %v3053_v38 = vunpack.i.l.bf16 %v3052_v36  ;;  %2963 = vmatprep.subr.bf16.mxu0 %v2962_v23  ;;  %v2418_v36 = vld [vmem:[%s3762_s2 + $0xf8] sm:$0xff] }
0x11ca   : > { %2965 = vmatpush3.bf16.msra.mxu0 %v2962_v23  ;;  %v2414_v23 = vld [vmem:[%s3762_s2 + $0xd8] sm:$0xff] }
0x11cb   : > { %v3104_v39 = vpop.eup %3103  ;;  %v2972_v41 = vpack.c.bf16 %v3054_v37, %v3053_v38  ;;  %v2992_v22 = vpack.c.bf16 %v2414_v23, %v2410_v35  ;;  %v2422_v37 = vld [vmem:[%s3762_s2 + $0x118] sm:$0xff] }
0x11cc   : > { %v1847_v42 = vmul.f32 %v3104_v39, %v3096_v19  ;;  %v2421_v19 = vld [vmem:[%s3762_s2 + $0x110] sm:$0xff]  ;;  %v2996_v38 = vpack.c.bf16 %v2422_v37, %v2418_v36 }
0x11cd   : > { %2751 = vmatmul.mubr.msk.f32.vlgmr.msra.gmra.mrb[8].mxu0 %vm667_vm1, %v1649_v40  ;;  %2973 = vmatprep.subr.bf16.mxu0 %v2972_v41  ;;  %v2988_v20 = vpack.c.bf16 %v2421_v19, %v2417_v17  ;;  %v2425_v39 = vld [vmem:[%s3762_s2 + $0x130] sm:$0xff] }
0x11ce   : > { %2975 = vmatpush3.bf16.msra.mxu0 %v2972_v41  ;;  %2764 = vmatprep.mubr.msk.f32.mxu0 %vm667_vm1, %v1847_v42  ;;  %v2065_v40 = vrot.slane %v2425_v39, %v3470_v54 }
0x11cf   : > { %v3106_v43 = vpop.eup %3105  ;;  %2977 = vmatprep.subr.bf16.mxu0 %v2976_v47  ;;  %2989 = vmatprep.subr.bf16.mxu1 %v2988_v20 }
0x11d0   : > { %v1849_v44 = vmul.f32 %v3106_v43, %v3098_v21  ;;  %2991 = vmatpush3.bf16.msra.mxu1 %v2988_v20 }
0x11d2   : > { %2765 = vmatmul.mubr.msk.f32.vlgmr.msra.gmra.mrb[10].mxu0 %vm667_vm1, %v1849_v44 }
0x11d3   : > { %2979 = vmatpush3.bf16.msra.mxu0 %v2976_v47 }
0x11d4   : > { %2981 = vmatprep.subr.bf16.mxu0 %v2980_v50 }
0x11d7   : > { %2983 = vmatpush3.bf16.msra.mxu0 %v2980_v50 }
0x11d8   : > { %2993 = vmatprep.subr.bf16.mxu0 %v2992_v22 }
0x12a0   : > { %v2752_v51 = vpop.f32.mrb[8].mxu0 }
0x12a1   : > { %v1728_v52 = vpop.f32.mrb[9].mxu0 }
0x12a5   : > { %v2766_v55 = vpop.f32.mrb[10].mxu0 }
0x12a6   : > { %v1928_v56 = vpop.f32.mrb[11].mxu0 }
0x12a7   : > { %1939 = vrot.lane.b32.xlu1 %v1928_v56, %s3137_s20 }
0x12ab   : > { %1941 = vrot.lane.b32.xlu1 %v2766_v55, %s3137_s20 }
0x1319   : > { %v1940_v57 = vpop.permute.xlu1 %1939 }
0x131a   : > { %v1945_v58 = vsel %vm667_vm1, %v1728_v52, %v1940_v57 }
0x131b   : > { %2775 = vmatprep.mubr.msk.f32.mxu0 %vm544_vm0, %v1945_v58 }
0x131d   : > { %v1942_v59 = vpop.permute.xlu1 %1941 }
0x131e   : > { %v1946_v60 = vsel %vm667_vm1, %v2752_v51, %v1942_v59 }
0x131f   : > { %2776 = vmatmul.mubr.msk.f32.vlgmr.msra.gmra.mrb[12].mxu0 %vm544_vm0, %v1946_v60 }
0x1320   : > { %2995 = vmatpush3.bf16.xpose.msra.mxu0 %v2992_v22  ;;  %v2426_v22 = vld [vmem:[%s3762_s2 + $0x138] sm:$0xff] }
0x1321   : > { %2997 = vmatprep.subr.bf16.mxu0 %v2996_v38  ;;  %v2281_v36 = vrot.slane %v2426_v22, %v3470_v54 }
0x1328   : > { %2999 = vmatpush3.bf16.xpose.msra.mxu0 %v2996_v38 }
0x13f2   : > { %v2777_v63 = vpop.f32.mrb[12].mxu0 }
0x13f3   : > { %v2029_v61 = vadd.f32 %v2777_v63, %v3600_v8  ;;  %v2019_v0 = vpop.f32.mrb[13].mxu0 }
0x13f4   : > { %v2028_v2 = vadd.f32 %v2019_v0, %v3602_v7 }
0x13f5   : > { %v3694_v3 = vadd.f32 %v2033_v1, %v2029_v61 }
0x13f6   : > { %v3696_v6 = vadd.f32 %v2033_v1, %v2028_v2 }
0x13f7   : > { %v2039_v4 = vsel %vm544_vm0, %v3694_v3, 0.0 }
0x13f8   : > { %2040 = vadd.xlane.f32.xlu1 %v2039_v4  ;;  %v2036_v9 = vsel %vm544_vm0, %v3696_v6, 0.0 }
0x13f9   : > { %2037 = vadd.xlane.f32.xlu0 %v2036_v9 }
0x1485   : > { %v2041_v10 = vpop.xlane.xlu1 %2040 }
0x1486   : > { %v2043_v11 = vmul.f32 0.03125, %v2041_v10  ;;  %v2038_v12 = vpop.xlane.xlu0 %2037 }
0x1487   : > { %v2042_v13 = vmul.f32 0.03125, %v2038_v12 }
0x1488   : > { %v2045_v8 = vsub.f32 %v3694_v3, %v2043_v11 }
0x1489   : > { %v2044_v7 = vsub.f32 %v3696_v6, %v2042_v13 }
0x148a   : > { %v2047_v5 = vmul.f32 %v2045_v8, %v2045_v8 }
0x148b   : > { %v2046_v28 = vmul.f32 %v2044_v7, %v2044_v7 }
0x148c   : > { %v2051_v14 = vsel %vm544_vm0, %v2047_v5, 0.0 }
0x148d   : > { %v2048_v29 = vsel %vm544_vm0, %v2046_v28, 0.0 }
0x148e   : > { %2049 = vadd.xlane.f32.xlu0 %v2048_v29 }
0x1492   : > { %2052 = vadd.xlane.f32.xlu0 %v2051_v14 }
0x151b   : > { %v2050_v21 = vpop.xlane.xlu0 %2049 }
0x151c   : > { %v2054_v24 = vmul.f32 0.03125, %v2050_v21 }
0x151e   : > { %v2056_v25 = vadd.f32 1e-06, %v2054_v24 }
0x151f   : > { %v2053_v26 = vpop.xlane.xlu0 %2052 }
0x1520   : > { %3107 = vrsqrt.f32 %v2056_v25  ;;  %v2055_v27 = vmul.f32 0.03125, %v2053_v26 }
0x1522   : > { %v2057_v30 = vadd.f32 1e-06, %v2055_v27 }
0x1524   : > { %3109 = vrsqrt.f32 %v2057_v30 }
0x152a   : > { %v3108_v31 = vpop.eup %3107 }
0x152b   : > { %v2060_v32 = vmul.f32 %v3108_v31, %v2044_v7 }
0x152d   : > { %2786 = vmatprep.mubr.msk.f32.mxu1 %vm544_vm0, %v2060_v32 }
0x152e   : > { %v3110_v33 = vpop.eup %3109 }
0x152f   : > { %v2061_v34 = vmul.f32 %v3110_v33, %v2045_v8 }
0x1531   : > { %2787 = vmatmul.mubr.msk.f32.vlgmr.msra.gmra.mrb[24].mxu1 %vm544_vm0, %v2061_v34 }
0x1604   : > { %v2788_v41 = vpop.f32.mrb[24].mxu1 }
0x1605   : > { %v2144_v42 = vadd.f32 %v2788_v41, %v2065_v40  ;;  %v2138_v43 = vpop.f32.mrb[25].mxu1 }
0x1606   : > { %v2139_v44 = vadd.f32 %v2138_v43, %v2065_v40 }
0x1607   : > { %v2150_v45 = vmul.f32 0.70710677, %v2144_v42  ;;  %v2148_v34 = vmul.f32 0.5, %v2144_v42 }
0x1608   : > { %v2149_v46 = vmul.f32 0.70710677, %v2139_v44  ;;  %v2147_v32 = vmul.f32 0.5, %v2139_v44 }
0x1609   : > { %v2152_v47 = vand.u32 2147483647, %v2150_v45  ;;  %vm2192_vm5 = vcmp.lt.f32.partialorder %v2150_v45, 0.0 }
0x160a   : > { %v2151_v48 = vand.u32 2147483647, %v2149_v46  ;;  %vm2191_vm6 = vcmp.lt.f32.partialorder %v2149_v46, 0.0 }
0x160b   : > { %v2154_v49 = vmul.f32 0.3275911, %v2152_v47  ;;  %v2180_v55 = vsub.f32 0.0, %v2152_v47 }
0x160c   : > { %v2153_v50 = vmul.f32 0.3275911, %v2151_v48  ;;  %v2179_v56 = vsub.f32 0.0, %v2151_v48 }
0x160d   : > { %v2156_v51 = vadd.f32 1.0, %v2154_v49  ;;  %v2182_v58 = vmul.f32 %v2180_v55, %v2152_v47 }
0x160e   : > { %v2155_v52 = vadd.f32 1.0, %v2153_v50  ;;  %v2181_v62 = vmul.f32 %v2179_v56, %v2151_v48 }
0x160f   : > { %3111 = vrcp.f32 %v2156_v51  ;;  %v2185_v61 = vmul.f32 1.442695, %v2182_v58 }
0x1610   : > { %3113 = vrcp.f32 %v2155_v52  ;;  %v2183_v4 = vmul.f32 1.442695, %v2181_v62  ;;  %v2318_v62 = vsub.s32 1, %v3467_v53 }
0x1611   : > { %3115 = vpow2.f32 %v2185_v61 }
0x1612   : > { %3117 = vpow2.f32 %v2183_v4 }
0x1619   : > { %v3112_v57 = vpop.eup %3111 }
0x161a   : > { %v3114_v59 = vpop.eup %3113  ;;  %v2162_v60 = vmul.f32 1.0614054, %v3112_v57 }
0x161b   : > { %v2161_v1 = vmul.f32 1.0614054, %v3114_v59  ;;  %v3116_v16 = vpop.eup %3115 }
0x161c   : > { %v2164_v63 = vadd.f32 -1.4531521, %v2162_v60  ;;  %v3118_v18 = vpop.eup %3117 }
0x161d   : > { %v2163_v0 = vadd.f32 -1.4531521, %v2161_v1  ;;  %v3123_v1 = vld [vmem:[%s3763_s3 + $0x10] sm:$0x7] }
0x161e   : > { %v2166_v2 = vmul.f32 %v3112_v57, %v2164_v63  ;;  %v2313_v63 = vrot.slane %v3123_v1, %v3470_v54  ;;  %v2319_v4 = vrot.slane %v3123_v1, %v2318_v62 }
0x161f   : > { %v2165_v9 = vmul.f32 %v3114_v59, %v2163_v0 }
0x1620   : > { %v2168_v10 = vadd.f32 1.4214138, %v2166_v2 }
0x1621   : > { %v2167_v11 = vadd.f32 1.4214138, %v2165_v9 }
0x1622   : > { %v2170_v12 = vmul.f32 %v3112_v57, %v2168_v10 }
0x1623   : > { %v2169_v13 = vmul.f32 %v3114_v59, %v2167_v11 }
0x1624   : > { %v2172_v8 = vadd.f32 -0.28449672, %v2170_v12 }
0x1625   : > { %v2171_v7 = vadd.f32 -0.28449672, %v2169_v13 }
0x1626   : > { %v2174_v28 = vmul.f32 %v3112_v57, %v2172_v8 }
0x1627   : > { %v2173_v29 = vmul.f32 %v3114_v59, %v2171_v7 }
0x1628   : > { %v2176_v5 = vadd.f32 0.2548296, %v2174_v28 }
0x1629   : > { %v2175_v14 = vadd.f32 0.2548296, %v2173_v29 }
0x162a   : > { %v2178_v15 = vmul.f32 %v3112_v57, %v2176_v5 }
0x162b   : > { %v2177_v17 = vmul.f32 %v3114_v59, %v2175_v14 }
0x162c   : > { %v2188_v19 = vmul.f32 %v3116_v16, %v2178_v15 }
0x162d   : > { %v2187_v20 = vmul.f32 %v3118_v18, %v2177_v17 }
0x162e   : > { %v2190_v21 = vsub.f32 1.0, %v2188_v19 }
0x162f   : > { %v2189_v24 = vsub.f32 1.0, %v2187_v20 }
0x1630   : > { %v2194_v25 = vsub.f32 0.0, %v2190_v21 }
0x1631   : > { %v2193_v26 = vsub.f32 0.0, %v2189_v24 }
0x1632   : > { %v2196_v27 = vsel %vm2192_vm5, %v2194_v25, %v2190_v21 }
0x1633   : > { %v2198_v30 = vadd.f32 1.0, %v2196_v27  ;;  %v2195_v31 = vsel %vm2191_vm6, %v2193_v26, %v2189_v24 }
0x1634   : > { %v2197_v33 = vadd.f32 1.0, %v2195_v31 }
0x1635   : > { %v2200_v23 = vmul.f32 %v2198_v30, %v2148_v34 }
0x1636   : > { %v2199_v35 = vmul.f32 %v2197_v33, %v2147_v32 }
0x1638   : > { %2797 = vmatprep.mubr.f32.mxu0 %v2199_v35 }
0x1639   : > { %2798 = vmatmul.mubr.f32.vlgmr.msra.gmra.mrb[14].mxu0 %v2200_v23 }
0x170c   : > { %v2799_v37 = vpop.f32.mrb[14].mxu0 }
0x170d   : > { %v2277_v38 = vadd.f32 %v2799_v37, %v3694_v3  ;;  %v2267_v39 = vpop.f32.mrb[15].mxu0 }
0x170e   : > { %v2276_v40 = vadd.f32 %v2267_v39, %v3696_v6 }
0x170f   : > { %v2283_v41 = vadd.f32 %v2281_v36, %v2277_v38 }
0x1710   : > { %v2282_v43 = vadd.f32 %v2281_v36, %v2276_v40 }
0x1711   : > { %v2287_v42 = vsel %vm544_vm0, %v2283_v41, 0.0 }
0x1712   : > { %2288 = vadd.xlane.f32.xlu1 %v2287_v42  ;;  %v2284_v44 = vsel %vm544_vm0, %v2282_v43, 0.0 }
0x1713   : > { %2285 = vadd.xlane.f32.xlu0 %v2284_v44 }
0x179f   : > { %v2289_v45 = vpop.xlane.xlu1 %2288 }
0x17a0   : > { %v2291_v46 = vmul.f32 0.03125, %v2289_v45  ;;  %v2286_v47 = vpop.xlane.xlu0 %2285 }
0x17a1   : > { %v2290_v48 = vmul.f32 0.03125, %v2286_v47 }
0x17a2   : > { %v2293_v49 = vsub.f32 %v2283_v41, %v2291_v46 }
0x17a3   : > { %v2292_v50 = vsub.f32 %v2282_v43, %v2290_v48 }
0x17a4   : > { %v2295_v51 = vmul.f32 %v2293_v49, %v2293_v49 }
0x17a5   : > { %v2294_v52 = vmul.f32 %v2292_v50, %v2292_v50 }
0x17a6   : > { %v2299_v3 = vsel %vm544_vm0, %v2295_v51, 0.0 }
0x17a7   : > { %2300 = vadd.xlane.f32.xlu1 %v2299_v3  ;;  %v2296_v6 = vsel %vm544_vm0, %v2294_v52, 0.0 }
0x17a8   : > { %2297 = vadd.xlane.f32.xlu0 %v2296_v6 }
0x1834   : > { %v2301_v55 = vpop.xlane.xlu1 %2300 }
0x1835   : > { %v2303_v56 = vmul.f32 0.03125, %v2301_v55  ;;  %v2298_v57 = vpop.xlane.xlu0 %2297 }
0x1836   : > { %v2302_v58 = vmul.f32 0.03125, %v2298_v57 }
0x1837   : > { %v2305_v59 = vadd.f32 1e-06, %v2303_v56 }
0x1838   : > { %v2304_v60 = vadd.f32 1e-06, %v2302_v58 }
0x1839   : > { %3119 = vrsqrt.f32 %v2305_v59 }
0x183a   : > { %3121 = vrsqrt.f32 %v2304_v60 }
0x1843   : > { %v3120_v61 = vpop.eup %3119 }
0x1844   : > { %v3122_v0 = vpop.eup %3121  ;;  %v2309_v2 = vmul.f32 %v3120_v61, %v2293_v49 }
0x1845   : > { %v2308_v9 = vmul.f32 %v3122_v0, %v2292_v50 }
0x1846   : > { %v2315_v10 = vmul.f32 %v2313_v63, %v2309_v2 }
0x1847   : > { %v2314_v11 = vmul.f32 %v2313_v63, %v2308_v9 }
0x1848   : > { %v2321_v53 = vadd.f32 %v2319_v4, %v2315_v10 }
0x1849   : > { %v2320_v12 = vadd.f32 %v2319_v4, %v2314_v11 }
0x184a   : > { %2323 = vst.msk [vmem:[%s202_s22 + $0x8] sm:$0xff] %vm544_vm0, %v2321_v53 }
0x184b   : > { %2322 = vst.msk [vmem:[%s202_s22] sm:$0xff] %vm544_vm0, %v2320_v12 }
0x184c PF: > { %s14_s15 = sadd.s32 1, %s3130_s15  }
0x184d   : > { %p11_p4 = scmp.ge.s32.totalorder %s14_s15, 4  }
0x184f   :  { %13 = sbr.rel (!%p11_p4) target bundleno = 1 (0x1), region = 67 }

</bundles_post_ra>
